<compile_context>
chip_gen: v7x
topology: tpu7x:2x2x1
jax: 0.10.0
libtpu: 0.0.40
codegen_flags: <defaults>
</compile_context>

<pallas_src>
import functools

import jax
import jax.numpy as jnp
from jax.experimental import pallas as pl
from jax.experimental.pallas import tpu as pltpu


def _round_up(x, m):
    return ((x + m - 1) // m) * m


@functools.lru_cache(maxsize=1)
def _vmem_budget_bytes():
    """~75% of physical VMEM; conservative 48 MiB fallback (safe on v7x)."""
    try:
        cap = int(pltpu.get_tpu_info().vmem_capacity_bytes)
        if cap <= 0:
            raise ValueError
    except Exception:
        cap = 64 << 20
    return (cap * 3) // 4


def _largest_tile(dim_p, cap):
    """Largest multiple-of-128 divisor of dim_p (itself a /128 multiple) <= cap."""
    units = dim_p // 128
    cap_units = max(1, cap // 128)
    best = 1
    for d in range(1, units + 1):
        if units % d == 0 and d <= cap_units:
            best = d
    return best * 128


def _choose_tiles(kp, np_, itemsize, w_tile_target):
    """Pick (tn, tk) dividing (np_, kp): wide lane-contiguous tn (>=2 j-blocks
    when possible, so both v7x TensorCores get work), then tk to fill the
    per-tile weight byte budget."""
    min_blocks_n = 2 if np_ >= 256 else 1
    tn = _largest_tile(np_, min(np_ // min_blocks_n, 4096))
    tk = _largest_tile(kp, max(128, w_tile_target // (tn * itemsize)))
    return tn, tk


def _linear_relu_kernel(x_ref, w_ref, b_ref, o_ref):
    """One (i, j, k) grid step of relu(x @ W + b).

    Grid = (1, Np//tn, Kp//tk); k is the reduction axis (last, 'arbitrary').
    o_ref is the f32 output block, resident across k and used as the accumulator.
    """
    k = pl.program_id(2)

    @pl.when(k == 0)
    def _():
        o_ref[...] = jnp.zeros_like(o_ref)

    o_ref[...] += jnp.dot(
        x_ref[...], w_ref[...], preferred_element_type=jnp.float32
    )

    @pl.when(k == pl.num_programs(2) - 1)
    def _():
        o_ref[...] = jnp.maximum(o_ref[...] + b_ref[...], 0.0)


def linear_relu(x, w, b):
    """relu(x @ w + b).

    x: [M, Kp] (any float dtype; cast to w.dtype for the MXU stream)
    w: [Kp, Np] pre-padded bf16 weight (= padded PyTorch weight.T)
    b: [1, Np]  pre-padded f32 bias
    Returns f32 [M, Np] (padded columns are exactly 0).
    """
    M, kx = x.shape
    kp, np_ = w.shape
    assert kx == kp and b.shape == (1, np_)
    x = x.astype(w.dtype)

    itemsize = jnp.dtype(w.dtype).itemsize
    budget = _vmem_budget_bytes()
    tn, tk = _choose_tiles(kp, np_, itemsize, w_tile_target=budget // 3)

    tm = M  # batch dim is tiny; full extent (allowed: equals the array dim)
    grid = (1, np_ // tn, kp // tk)

    # Explicit scoped-VMEM sizing: double-buffered W/x/bias/out tiles + headroom.
    vmem_bytes = (
        2 * (tk * tn * itemsize)   # W tiles (dominant)
        + 2 * (tm * tk * itemsize)  # x tiles
        + 2 * (tn * 4)              # bias tiles
        + 2 * (tm * tn * 4)         # f32 output blocks
    )
    vmem_limit = int(min(max(vmem_bytes + (4 << 20), 16 << 20), budget))

    cost = pl.CostEstimate(
        flops=2 * M * kp * np_,
        transcendentals=0,
        bytes_accessed=itemsize * (kp * np_ + M * kp) + 4 * (np_ + M * np_),
    )

    return pl.pallas_call(
        _linear_relu_kernel,
        out_shape=jax.ShapeDtypeStruct((M, np_), jnp.float32),
        grid_spec=pltpu.PrefetchScalarGridSpec(
            num_scalar_prefetch=0,
            grid=grid,
            in_specs=[
                pl.BlockSpec((tm, tk), lambda i, j, k: (i, k)),  # x tile (tiny)
                pl.BlockSpec((tk, tn), lambda i, j, k: (k, j)),  # W tile (big)
                pl.BlockSpec((1, tn), lambda i, j, k: (0, j)),   # bias tile
            ],
            out_specs=pl.BlockSpec((tm, tn), lambda i, j, k: (i, j)),
        ),
        compiler_params=pltpu.CompilerParams(
            dimension_semantics=("parallel", "parallel", "arbitrary"),
            vmem_limit_bytes=vmem_limit,
        ),
        cost_estimate=cost,
    )(x, w, b)


def prepare_params(params, compute_dtype=jnp.bfloat16):
    """One-time prep (OUTSIDE the per-call hot path): pad K/N up to multiples of
    128 with zeros (exact: zero rows/cols/bias contribute nothing, relu(0)=0 in
    padded output columns), cast weights to bf16, reshape bias to [1, Np]."""
    def prep(w, b):
        k, n = w.shape
        kp, np_ = _round_up(k, 128), _round_up(n, 128)
        wp = jnp.pad(w, ((0, kp - k), (0, np_ - n))).astype(compute_dtype)
        bp = jnp.pad(b, (0, np_ - n)).astype(jnp.float32).reshape(1, np_)
        return wp, bp

    w1, b1 = prep(params["w1"], params["b1"])
    w2, b2 = prep(params["w2"], params["b2"])
    return {"w1": w1, "b1": b1, "w2": w2, "b2": b2}


@jax.jit
def spex_forward(mixture, prepped):
    """mixture: [B, 1, D_in] -> enhanced: [B, 1, D_in]  (matches Model.forward)."""
    B, C, d_in = mixture.shape
    x = mixture.reshape(B * C, d_in)
    k1 = prepped["w1"].shape[0]
    if k1 != d_in:  # pad activations (tiny) to the pre-padded weight K
        x = jnp.pad(x, ((0, 0), (0, k1 - d_in)))
    h = linear_relu(x, prepped["w1"], prepped["b1"])   # fc1 + ReLU (padded hid)
    y = linear_relu(h, prepped["w2"], prepped["b2"])   # fc2 + ReLU
    return y[:, :d_in].reshape(B, C, d_in)


def init_params(key, d_in, d_hid, dtype=jnp.float32):
    """Deterministic synthetic parameters (PyTorch-Linear-style uniform init),
    stored as [in_features, out_features] == W.T of the PyTorch layer."""
    k1, k2, k3, k4 = jax.random.split(key, 4)
    bound1 = 1.0 / (d_in ** 0.5)
    bound2 = 1.0 / (d_hid ** 0.5)
    w1 = jax.random.uniform(k1, (d_in, d_hid), dtype, -bound1, bound1)
    b1 = jax.random.uniform(k2, (d_hid,), dtype, -bound1, bound1)
    w2 = jax.random.uniform(k3, (d_hid, d_in), dtype, -bound2, bound2)
    b2 = jax.random.uniform(k4, (d_in,), dtype, -bound2, bound2)
    return {"w1": w1, "b1": b1, "w2": w2, "b2": b2}


def _reference_forward_bf16(mixture, prepped):
    """Pure-JAX reference using the same prepared bf16 weights / f32 accumulation."""
    B, C, d_in = mixture.shape
    x = mixture.reshape(B * C, d_in)
    k1 = prepped["w1"].shape[0]
    if k1 != d_in:
        x = jnp.pad(x, ((0, 0), (0, k1 - d_in)))
    h = jnp.maximum(
        jnp.dot(x.astype(jnp.bfloat16), prepped["w1"],
                preferred_element_type=jnp.float32) + prepped["b1"], 0.0)
    y = jnp.maximum(
        jnp.dot(h.astype(jnp.bfloat16), prepped["w2"],
                preferred_element_type=jnp.float32) + prepped["b2"], 0.0)
    return y[:, :d_in].reshape(B, C, d_in)


if __name__ == "__main__":
    # Scaled-down but structurally identical config (real model: 32000 / 8000).
    # D_HID deliberately NOT a multiple of 128 to exercise the one-time padding
    # path that the real D_hid=8000 requires.
    B, D_IN, D_HID = 2, 1024, 320

    key = jax.random.PRNGKey(0)
    k_x, k_p = jax.random.split(key)
    mixture = jax.random.normal(k_x, (B, 1, D_IN), dtype=jnp.float32)
    raw_params = init_params(k_p, D_IN, D_HID)

    # One-time parameter prep (pad + bf16 cast) -- NOT in the per-call hot path.
    params = prepare_params(raw_params)

    out = spex_forward(mixture, params)
    out = jax.block_until_ready(out)
    assert out.shape == (B, 1, D_IN)

    # Tight check vs a JAX reference with the same bf16 weights / f32 accumulation.
    ref_bf16 = _reference_forward_bf16(mixture, params)
    assert jnp.allclose(out, ref_bf16, atol=1e-2, rtol=1e-2)

    # Loose check vs the original f32 math (difference = bf16 weight quantization).
    h_f32 = jnp.maximum(
        mixture.reshape(B, D_IN) @ raw_params["w1"] + raw_params["b1"], 0.0)
    y_f32 = jnp.maximum(
        h_f32 @ raw_params["w2"] + raw_params["b2"], 0.0).reshape(B, 1, D_IN)
    assert jnp.allclose(out, y_f32, atol=5e-2, rtol=5e-2)

    print("KERNEL_OK")
</pallas_src>

<mosaic_0001>
module attributes {stable_mosaic.version = 11 : i64} {
  func.func @_linear_relu_kernel(%arg0: i32, %arg1: i32, %arg2: i32, %arg3: memref<2x1024xbf16, #tpu.memory_space<vmem>>, %arg4: memref<1024x128xbf16, #tpu.memory_space<vmem>>, %arg5: memref<1x128xf32, #tpu.memory_space<vmem>>, %arg6: memref<2x128xf32, #tpu.memory_space<vmem>>) attributes {dimension_semantics = [#tpu.dimension_semantics<parallel>, #tpu.dimension_semantics<parallel>, #tpu.dimension_semantics<arbitrary>], iteration_bounds = array<i64: 1, 3, 1>, scalar_prefetch = 0 : i64, scratch_operands = 0 : i64, tpu.core_type = #tpu.core_type<tc>, window_params = [{transform_indices = @transform_0, window_bounds = array<i64: 2, 1024>}, {transform_indices = @transform_1, window_bounds = array<i64: 1024, 128>}, {transform_indices = @transform_2, window_bounds = array<i64: 1, 128>}, {transform_indices = @transform_3, window_bounds = array<i64: 2, 128>}]} {
    %c0_i32 = arith.constant 0 : i32
    %0 = arith.cmpi eq, %arg2, %c0_i32 : i32
    %1 = arith.extui %0 : i1 to i32
    %c0_i32_0 = arith.constant 0 : i32
    %2 = arith.cmpi ne, %1, %c0_i32_0 : i32
    scf.if %2 {
      %cst_10 = arith.constant 0.000000e+00 : f32
      %12 = vector.broadcast %cst_10 : f32 to vector<2x128xf32>
      %c0_11 = arith.constant 0 : index
      %c0_12 = arith.constant 0 : index
      %13 = vector.load %arg6[%c0_11, %c0_12] : memref<2x128xf32, #tpu.memory_space<vmem>>, vector<2x128xf32>
      tpu.vector_store %arg6[%c0_11, %c0_12], %12 {strides = array<i32>} : memref<2x128xf32, #tpu.memory_space<vmem>>, vector<2x128xf32>,
    } else {
    }
    %c0 = arith.constant 0 : index
    %c0_1 = arith.constant 0 : index
    %3 = vector.load %arg6[%c0, %c0_1] : memref<2x128xf32, #tpu.memory_space<vmem>>, vector<2x128xf32>
    %c0_2 = arith.constant 0 : index
    %c0_3 = arith.constant 0 : index
    %4 = vector.load %arg3[%c0_2, %c0_3] : memref<2x1024xbf16, #tpu.memory_space<vmem>>, vector<2x1024xbf16>
    %c0_4 = arith.constant 0 : index
    %c0_5 = arith.constant 0 : index
    %5 = vector.load %arg4[%c0_4, %c0_5] : memref<1024x128xbf16, #tpu.memory_space<vmem>>, vector<1024x128xbf16>
    %cst = arith.constant dense<0.000000e+00> : vector<2x128xf32>
    %6 = tpu.matmul %4, %5, %cst {dimension_numbers = #tpu.dot_dimension_numbers<[1], [0], [0], [1], [0, 0, 1, 1], [], []>} : vector<2x1024xbf16>, vector<1024x128xbf16>, vector<2x128xf32> -> vector<2x128xf32>
    %7 = arith.addf %3, %6 : vector<2x128xf32>
    %c0_6 = arith.constant 0 : index
    %c0_7 = arith.constant 0 : index
    %8 = vector.load %arg6[%c0_6, %c0_7] : memref<2x128xf32, #tpu.memory_space<vmem>>, vector<2x128xf32>
    tpu.vector_store %arg6[%c0_6, %c0_7], %7 {strides = array<i32>} : memref<2x128xf32, #tpu.memory_space<vmem>>, vector<2x128xf32>,
    %c0_i32_8 = arith.constant 0 : i32
    %9 = arith.cmpi eq, %arg2, %c0_i32_8 : i32
    %10 = arith.extui %9 : i1 to i32
    %c0_i32_9 = arith.constant 0 : i32
    %11 = arith.cmpi ne, %10, %c0_i32_9 : i32
    scf.if %11 {
      %c0_10 = arith.constant 0 : index
      %c0_11 = arith.constant 0 : index
      %12 = vector.load %arg6[%c0_10, %c0_11] : memref<2x128xf32, #tpu.memory_space<vmem>>, vector<2x128xf32>
      %c0_12 = arith.constant 0 : index
      %c0_13 = arith.constant 0 : index
      %13 = vector.load %arg5[%c0_12, %c0_13] : memref<1x128xf32, #tpu.memory_space<vmem>>, vector<1x128xf32>
      %14 = vector.broadcast %13 : vector<1x128xf32> to vector<2x128xf32>
      %15 = arith.addf %12, %14 : vector<2x128xf32>
      %cst_14 = arith.constant 0.000000e+00 : f32
      %16 = vector.broadcast %cst_14 : f32 to vector<2x128xf32>
      %17 = arith.maximumf %15, %16 : vector<2x128xf32>
      %c0_15 = arith.constant 0 : index
      %c0_16 = arith.constant 0 : index
      %18 = vector.load %arg6[%c0_15, %c0_16] : memref<2x128xf32, #tpu.memory_space<vmem>>, vector<2x128xf32>
      tpu.vector_store %arg6[%c0_15, %c0_16], %17 {strides = array<i32>} : memref<2x128xf32, #tpu.memory_space<vmem>>, vector<2x128xf32>,
    } else {
    }
    return
  }
  func.func @transform_0(%arg0: i32, %arg1: i32, %arg2: i32) -> (i32, i32) {
    %c0_i32 = arith.constant 0 : i32
    return %arg0, %arg2 : i32, i32
  }
  func.func @transform_1(%arg0: i32, %arg1: i32, %arg2: i32) -> (i32, i32) {
    %c0_i32 = arith.constant 0 : i32
    return %arg2, %arg1 : i32, i32
  }
  func.func @transform_2(%arg0: i32, %arg1: i32, %arg2: i32) -> (i32, i32) {
    %c0_i32 = arith.constant 0 : i32
    %c0_i32_0 = arith.constant 0 : i32
    return %c0_i32, %arg1 : i32, i32
  }
  func.func @transform_3(%arg0: i32, %arg1: i32, %arg2: i32) -> (i32, i32) {
    %c0_i32 = arith.constant 0 : i32
    return %arg0, %arg1 : i32, i32
  }
}

module attributes {stable_mosaic.version = 11 : i64} {
  func.func @_linear_relu_kernel(%arg0: i32, %arg1: i32, %arg2: i32, %arg3: memref<2x384xbf16, #tpu.memory_space<vmem>>, %arg4: memref<384x512xbf16, #tpu.memory_space<vmem>>, %arg5: memref<1x512xf32, #tpu.memory_space<vmem>>, %arg6: memref<2x512xf32, #tpu.memory_space<vmem>>) attributes {dimension_semantics = [#tpu.dimension_semantics<parallel>, #tpu.dimension_semantics<parallel>, #tpu.dimension_semantics<arbitrary>], iteration_bounds = array<i64: 1, 2, 1>, scalar_prefetch = 0 : i64, scratch_operands = 0 : i64, tpu.core_type = #tpu.core_type<tc>, window_params = [{transform_indices = @transform_0, window_bounds = array<i64: 2, 384>}, {transform_indices = @transform_1, window_bounds = array<i64: 384, 512>}, {transform_indices = @transform_2, window_bounds = array<i64: 1, 512>}, {transform_indices = @transform_3, window_bounds = array<i64: 2, 512>}]} {
    %c0_i32 = arith.constant 0 : i32
    %0 = arith.cmpi eq, %arg2, %c0_i32 : i32
    %1 = arith.extui %0 : i1 to i32
    %c0_i32_0 = arith.constant 0 : i32
    %2 = arith.cmpi ne, %1, %c0_i32_0 : i32
    scf.if %2 {
      %cst_10 = arith.constant 0.000000e+00 : f32
      %12 = vector.broadcast %cst_10 : f32 to vector<2x512xf32>
      %c0_11 = arith.constant 0 : index
      %c0_12 = arith.constant 0 : index
      %13 = vector.load %arg6[%c0_11, %c0_12] : memref<2x512xf32, #tpu.memory_space<vmem>>, vector<2x512xf32>
      tpu.vector_store %arg6[%c0_11, %c0_12], %12 {strides = array<i32>} : memref<2x512xf32, #tpu.memory_space<vmem>>, vector<2x512xf32>,
    } else {
    }
    %c0 = arith.constant 0 : index
    %c0_1 = arith.constant 0 : index
    %3 = vector.load %arg6[%c0, %c0_1] : memref<2x512xf32, #tpu.memory_space<vmem>>, vector<2x512xf32>
    %c0_2 = arith.constant 0 : index
    %c0_3 = arith.constant 0 : index
    %4 = vector.load %arg3[%c0_2, %c0_3] : memref<2x384xbf16, #tpu.memory_space<vmem>>, vector<2x384xbf16>
    %c0_4 = arith.constant 0 : index
    %c0_5 = arith.constant 0 : index
    %5 = vector.load %arg4[%c0_4, %c0_5] : memref<384x512xbf16, #tpu.memory_space<vmem>>, vector<384x512xbf16>
    %cst = arith.constant dense<0.000000e+00> : vector<2x512xf32>
    %6 = tpu.matmul %4, %5, %cst {dimension_numbers = #tpu.dot_dimension_numbers<[1], [0], [0], [1], [0, 0, 1, 1], [], []>} : vector<2x384xbf16>, vector<384x512xbf16>, vector<2x512xf32> -> vector<2x512xf32>
    %7 = arith.addf %3, %6 : vector<2x512xf32>
    %c0_6 = arith.constant 0 : index
    %c0_7 = arith.constant 0 : index
    %8 = vector.load %arg6[%c0_6, %c0_7] : memref<2x512xf32, #tpu.memory_space<vmem>>, vector<2x512xf32>
    tpu.vector_store %arg6[%c0_6, %c0_7], %7 {strides = array<i32>} : memref<2x512xf32, #tpu.memory_space<vmem>>, vector<2x512xf32>,
    %c0_i32_8 = arith.constant 0 : i32
    %9 = arith.cmpi eq, %arg2, %c0_i32_8 : i32
    %10 = arith.extui %9 : i1 to i32
    %c0_i32_9 = arith.constant 0 : i32
    %11 = arith.cmpi ne, %10, %c0_i32_9 : i32
    scf.if %11 {
      %c0_10 = arith.constant 0 : index
      %c0_11 = arith.constant 0 : index
      %12 = vector.load %arg6[%c0_10, %c0_11] : memref<2x512xf32, #tpu.memory_space<vmem>>, vector<2x512xf32>
      %c0_12 = arith.constant 0 : index
      %c0_13 = arith.constant 0 : index
      %13 = vector.load %arg5[%c0_12, %c0_13] : memref<1x512xf32, #tpu.memory_space<vmem>>, vector<1x512xf32>
      %14 = vector.broadcast %13 : vector<1x512xf32> to vector<2x512xf32>
      %15 = arith.addf %12, %14 : vector<2x512xf32>
      %cst_14 = arith.constant 0.000000e+00 : f32
      %16 = vector.broadcast %cst_14 : f32 to vector<2x512xf32>
      %17 = arith.maximumf %15, %16 : vector<2x512xf32>
      %c0_15 = arith.constant 0 : index
      %c0_16 = arith.constant 0 : index
      %18 = vector.load %arg6[%c0_15, %c0_16] : memref<2x512xf32, #tpu.memory_space<vmem>>, vector<2x512xf32>
      tpu.vector_store %arg6[%c0_15, %c0_16], %17 {strides = array<i32>} : memref<2x512xf32, #tpu.memory_space<vmem>>, vector<2x512xf32>,
    } else {
    }
    return
  }
  func.func @transform_0(%arg0: i32, %arg1: i32, %arg2: i32) -> (i32, i32) {
    %c0_i32 = arith.constant 0 : i32
    return %arg0, %arg2 : i32, i32
  }
  func.func @transform_1(%arg0: i32, %arg1: i32, %arg2: i32) -> (i32, i32) {
    %c0_i32 = arith.constant 0 : i32
    return %arg2, %arg1 : i32, i32
  }
  func.func @transform_2(%arg0: i32, %arg1: i32, %arg2: i32) -> (i32, i32) {
    %c0_i32 = arith.constant 0 : i32
    %c0_i32_0 = arith.constant 0 : i32
    return %c0_i32, %arg1 : i32, i32
  }
  func.func @transform_3(%arg0: i32, %arg1: i32, %arg2: i32) -> (i32, i32) {
    %c0_i32 = arith.constant 0 : i32
    return %arg0, %arg1 : i32, i32
  }
}

</mosaic_0001>

<bundles_post_ra>
// kernel: spex_forward.3
= control target key start
LH: loop header
LB: loop body
LE: loop exit
PB: predicated region body
PF: predicated region fallthrough
CT: control target
= control target key end

     0   :  { %s1804_s12 = smov 0   ;;  %s1806_s13 = smov 0   ;;  %s2196_s0 = inlined_call_operand.vmem [shape: bf16[2,384], index: 0, kind: input, shape index: {}]   ;;  %s2197_s1 = inlined_call_operand.vmem [shape: bf16[384,1024], index: 1, kind: input, shape index: {}]   ;;  %s2198_s2 = inlined_call_operand.vmem [shape: f32[1,1024], index: 2, kind: input, shape index: {}]   ;;  %s2199_s3 = inlined_call_operand.vmem [shape: f32[2,1024], index: 3, kind: output, shape index: {}]  }
   0x1   :  { %s1808_s14 = smov 0   ;;  %s1810_s15 = smov 0  }
   0x2   :  { %s1812_s16 = smov 0  }
   0x3 LB: > { %s28_s17 = sadd.s32 1, %s1775_s15  ;;  %p76_p1 = scmp.ne.s32.totalorder %s1767_s13, %s1763_s12  ;;  %s1779_s16 = sphi %s1812_s16, %s13_s16   ;;  %s1775_s15 = sphi %s1810_s15, %s2203_s15   ;;  %s1771_s14 = sphi %s1808_s14, %s2202_s14   ;;  %s1767_s13 = sphi %s1806_s13, %s2201_s13   ;;  %s1763_s12 = sphi %s1804_s12, %s2200_s12  }
   0x4   : > { %p30_p0 = scmp.ge.s32.totalorder %s28_s17, 2  ;;  %p77_p2 = scmp.eq.s32.totalorder %s1779_s16, 0 }
   0x5   : > { %s69_s19 = sadd.s32 1, %s1767_s13  ;;  %p1436_p5 = scmp.ge.s32.totalorder %s1779_s16, 2 }
   0x6   : > { %s2205_s17 = smov (%p30_p0, %s28_s17), 0  ;;  %p78_p3 = por %p77_p2, %p76_p1 }
   0x7   : > { %s65_s18 = ssub.s32 %s1775_s15, %s2205_s17  ;;  %168 = sbr.rel (%p1436_p5) target bundleno = 66 (0x42), region = 20 }
   0x8   : > { %p67_p4 = scmp.eq.s32.totalorder %s65_s18, 0 }
   0xa   : > { %s1839_s20 = scalar_select %p67_p4, %s1767_s13, %s69_s19  }
   0xe   : > { %171 = sbr.rel (!%p78_p3) target bundleno = 66 (0x42), region = 24  ;;  %s173_s21 = sand.u32 (%p78_p3), 1, %s1767_s13  }
   0xf   : > { %s1542_s22 = sshll.u32 (%p78_p3), %s1775_s15, 4  ;;  %s1551_s23 = smul.u32 (%p78_p3), 768, %s173_s21 }
  0x10   : > { %s1847_s26 = scalar_lea.vmem (%p78_p3), %s2197_s1, %s1542_s22 }
  0x11   : > { %v194_v0 = vld [vmem:[%s1847_s26] sm:$0xff] (%p78_p3)  ;;  %v196_v1 = vld [vmem:[%s1847_s26 + $0x8] sm:$0xff] (%p78_p3)  ;;  %s1855_s27 = scalar_lea.vmem (%p78_p3), [#allocation2], %s1551_s23 }
  0x12   : > { %v198_v2 = vld [vmem:[%s1847_s26 + $0x20] sm:$0xff] (%p78_p3)  ;;  %v200_v3 = vld [vmem:[%s1847_s26 + $0x28] sm:$0xff] (%p78_p3)  ;;  %195 = vst [vmem:[%s1855_s27] sm:$0xff] (%p78_p3), %v194_v0  ;;  %197 = vst [vmem:[%s1855_s27 + $0x8] sm:$0xff] (%p78_p3), %v196_v1 }
  0x13   : > { %v202_v4 = vld [vmem:[%s1847_s26 + $0x40] sm:$0xff] (%p78_p3)  ;;  %v204_v5 = vld [vmem:[%s1847_s26 + $0x48] sm:$0xff] (%p78_p3)  ;;  %199 = vst [vmem:[%s1855_s27 + $0x10] sm:$0xff] (%p78_p3), %v198_v2  ;;  %201 = vst [vmem:[%s1855_s27 + $0x18] sm:$0xff] (%p78_p3), %v200_v3 }
  0x14   : > { %203 = vst [vmem:[%s1855_s27 + $0x20] sm:$0xff] (%p78_p3), %v202_v4  ;;  %205 = vst [vmem:[%s1855_s27 + $0x28] sm:$0xff] (%p78_p3), %v204_v5  ;;  %v206_v6 = vld [vmem:[%s1847_s26 + $0x60] sm:$0xff] (%p78_p3)  ;;  %v208_v7 = vld [vmem:[%s1847_s26 + $0x68] sm:$0xff] (%p78_p3) }
  0x15   : > { %v210_v8 = vld [vmem:[%s1847_s26 + $0x80] sm:$0xff]  ;;  %207 = vst [vmem:[%s1855_s27 + $0x30] sm:$0xff] %v206_v6  ;;  %209 = vst [vmem:[%s1855_s27 + $0x38] sm:$0xff] %v208_v7  ;;  %v212_v9 = vld [vmem:[%s1847_s26 + $0x88] sm:$0xff] }
  0x16   : > { %211 = vst [vmem:[%s1855_s27 + $0x40] sm:$0xff] %v210_v8  ;;  %v214_v10 = vld [vmem:[%s1847_s26 + $0xa0] sm:$0xff]  ;;  %v216_v11 = vld [vmem:[%s1847_s26 + $0xa8] sm:$0xff]  ;;  %213 = vst [vmem:[%s1855_s27 + $0x48] sm:$0xff] %v212_v9 }
  0x17   : > { %215 = vst [vmem:[%s1855_s27 + $0x50] sm:$0xff] %v214_v10  ;;  %217 = vst [vmem:[%s1855_s27 + $0x58] sm:$0xff] %v216_v11  ;;  %v218_v12 = vld [vmem:[%s1847_s26 + $0xc0] sm:$0xff]  ;;  %v220_v13 = vld [vmem:[%s1847_s26 + $0xc8] sm:$0xff] }
  0x18   : > { %v222_v14 = vld [vmem:[%s1847_s26 + $0xe0] sm:$0xff]  ;;  %219 = vst [vmem:[%s1855_s27 + $0x60] sm:$0xff] %v218_v12  ;;  %221 = vst [vmem:[%s1855_s27 + $0x68] sm:$0xff] %v220_v13  ;;  %v224_v15 = vld [vmem:[%s1847_s26 + $0xe8] sm:$0xff] }
  0x19   : > { %223 = vst [vmem:[%s1855_s27 + $0x70] sm:$0xff] %v222_v14  ;;  %v226_v16 = vld [vmem:[%s1847_s26 + $0x100] sm:$0xff]  ;;  %v228_v17 = vld [vmem:[%s1847_s26 + $0x108] sm:$0xff]  ;;  %225 = vst [vmem:[%s1855_s27 + $0x78] sm:$0xff] %v224_v15 }
  0x1a   : > { %227 = vst [vmem:[%s1855_s27 + $0x80] sm:$0xff] %v226_v16  ;;  %229 = vst [vmem:[%s1855_s27 + $0x88] sm:$0xff] %v228_v17  ;;  %v230_v18 = vld [vmem:[%s1847_s26 + $0x120] sm:$0xff]  ;;  %v232_v19 = vld [vmem:[%s1847_s26 + $0x128] sm:$0xff] }
  0x1b   : > { %v234_v20 = vld [vmem:[%s1847_s26 + $0x140] sm:$0xff]  ;;  %231 = vst [vmem:[%s1855_s27 + $0x90] sm:$0xff] %v230_v18  ;;  %233 = vst [vmem:[%s1855_s27 + $0x98] sm:$0xff] %v232_v19  ;;  %v236_v21 = vld [vmem:[%s1847_s26 + $0x148] sm:$0xff] }
  0x1c   : > { %235 = vst [vmem:[%s1855_s27 + $0xa0] sm:$0xff] %v234_v20  ;;  %v238_v22 = vld [vmem:[%s1847_s26 + $0x160] sm:$0xff]  ;;  %v240_v23 = vld [vmem:[%s1847_s26 + $0x168] sm:$0xff]  ;;  %237 = vst [vmem:[%s1855_s27 + $0xa8] sm:$0xff] %v236_v21 }
  0x1d   : > { %239 = vst [vmem:[%s1855_s27 + $0xb0] sm:$0xff] %v238_v22  ;;  %241 = vst [vmem:[%s1855_s27 + $0xb8] sm:$0xff] %v240_v23  ;;  %v242_v24 = vld [vmem:[%s1847_s26 + $0x180] sm:$0xff]  ;;  %v244_v25 = vld [vmem:[%s1847_s26 + $0x188] sm:$0xff] }
  0x1e   : > { %v246_v26 = vld [vmem:[%s1847_s26 + $0x1a0] sm:$0xff]  ;;  %243 = vst [vmem:[%s1855_s27 + $0xc0] sm:$0xff] %v242_v24  ;;  %245 = vst [vmem:[%s1855_s27 + $0xc8] sm:$0xff] %v244_v25  ;;  %v248_v27 = vld [vmem:[%s1847_s26 + $0x1a8] sm:$0xff] }
  0x1f   : > { %247 = vst [vmem:[%s1855_s27 + $0xd0] sm:$0xff] %v246_v26  ;;  %v250_v28 = vld [vmem:[%s1847_s26 + $0x1c0] sm:$0xff]  ;;  %v252_v29 = vld [vmem:[%s1847_s26 + $0x1c8] sm:$0xff]  ;;  %249 = vst [vmem:[%s1855_s27 + $0xd8] sm:$0xff] %v248_v27 }
  0x20   : > { %251 = vst [vmem:[%s1855_s27 + $0xe0] sm:$0xff] %v250_v28  ;;  %253 = vst [vmem:[%s1855_s27 + $0xe8] sm:$0xff] %v252_v29  ;;  %v254_v30 = vld [vmem:[%s1847_s26 + $0x1e0] sm:$0xff]  ;;  %v256_v31 = vld [vmem:[%s1847_s26 + $0x1e8] sm:$0xff] }
  0x21   : > { %v258_v32 = vld [vmem:[%s1847_s26 + $0x200] sm:$0xff]  ;;  %255 = vst [vmem:[%s1855_s27 + $0xf0] sm:$0xff] %v254_v30  ;;  %257 = vst [vmem:[%s1855_s27 + $0xf8] sm:$0xff] %v256_v31  ;;  %v260_v33 = vld [vmem:[%s1847_s26 + $0x208] sm:$0xff] }
  0x22   : > { %259 = vst [vmem:[%s1855_s27 + $0x100] sm:$0xff] %v258_v32  ;;  %v262_v34 = vld [vmem:[%s1847_s26 + $0x220] sm:$0xff]  ;;  %v264_v35 = vld [vmem:[%s1847_s26 + $0x228] sm:$0xff]  ;;  %261 = vst [vmem:[%s1855_s27 + $0x108] sm:$0xff] %v260_v33 }
  0x23   : > { %263 = vst [vmem:[%s1855_s27 + $0x110] sm:$0xff] %v262_v34  ;;  %265 = vst [vmem:[%s1855_s27 + $0x118] sm:$0xff] %v264_v35  ;;  %v266_v36 = vld [vmem:[%s1847_s26 + $0x240] sm:$0xff]  ;;  %v268_v37 = vld [vmem:[%s1847_s26 + $0x248] sm:$0xff] }
  0x24   : > { %v270_v38 = vld [vmem:[%s1847_s26 + $0x260] sm:$0xff]  ;;  %267 = vst [vmem:[%s1855_s27 + $0x120] sm:$0xff] %v266_v36  ;;  %269 = vst [vmem:[%s1855_s27 + $0x128] sm:$0xff] %v268_v37  ;;  %v272_v39 = vld [vmem:[%s1847_s26 + $0x268] sm:$0xff] }
  0x25   : > { %271 = vst [vmem:[%s1855_s27 + $0x130] sm:$0xff] %v270_v38  ;;  %v274_v40 = vld [vmem:[%s1847_s26 + $0x280] sm:$0xff]  ;;  %v276_v41 = vld [vmem:[%s1847_s26 + $0x288] sm:$0xff]  ;;  %273 = vst [vmem:[%s1855_s27 + $0x138] sm:$0xff] %v272_v39 }
  0x26   : > { %275 = vst [vmem:[%s1855_s27 + $0x140] sm:$0xff] %v274_v40  ;;  %277 = vst [vmem:[%s1855_s27 + $0x148] sm:$0xff] %v276_v41  ;;  %v278_v42 = vld [vmem:[%s1847_s26 + $0x2a0] sm:$0xff]  ;;  %v280_v43 = vld [vmem:[%s1847_s26 + $0x2a8] sm:$0xff] }
  0x27   : > { %v282_v44 = vld [vmem:[%s1847_s26 + $0x2c0] sm:$0xff]  ;;  %279 = vst [vmem:[%s1855_s27 + $0x150] sm:$0xff] %v278_v42  ;;  %281 = vst [vmem:[%s1855_s27 + $0x158] sm:$0xff] %v280_v43  ;;  %v284_v45 = vld [vmem:[%s1847_s26 + $0x2c8] sm:$0xff] }
  0x28   : > { %283 = vst [vmem:[%s1855_s27 + $0x160] sm:$0xff] %v282_v44  ;;  %v286_v46 = vld [vmem:[%s1847_s26 + $0x2e0] sm:$0xff]  ;;  %v288_v47 = vld [vmem:[%s1847_s26 + $0x2e8] sm:$0xff]  ;;  %285 = vst [vmem:[%s1855_s27 + $0x168] sm:$0xff] %v284_v45 }
  0x29   : > { %287 = vst [vmem:[%s1855_s27 + $0x170] sm:$0xff] %v286_v46  ;;  %289 = vst [vmem:[%s1855_s27 + $0x178] sm:$0xff] %v288_v47  ;;  %v290_v48 = vld [vmem:[%s1847_s26 + $0x300] sm:$0xff]  ;;  %v292_v49 = vld [vmem:[%s1847_s26 + $0x308] sm:$0xff] }
  0x2a   : > { %v294_v50 = vld [vmem:[%s1847_s26 + $0x320] sm:$0xff]  ;;  %291 = vst [vmem:[%s1855_s27 + $0x180] sm:$0xff] %v290_v48  ;;  %293 = vst [vmem:[%s1855_s27 + $0x188] sm:$0xff] %v292_v49  ;;  %v296_v51 = vld [vmem:[%s1847_s26 + $0x328] sm:$0xff] }
  0x2b   : > { %295 = vst [vmem:[%s1855_s27 + $0x190] sm:$0xff] %v294_v50  ;;  %v298_v52 = vld [vmem:[%s1847_s26 + $0x340] sm:$0xff]  ;;  %v300_v53 = vld [vmem:[%s1847_s26 + $0x348] sm:$0xff]  ;;  %297 = vst [vmem:[%s1855_s27 + $0x198] sm:$0xff] %v296_v51 }
  0x2c   : > { %299 = vst [vmem:[%s1855_s27 + $0x1a0] sm:$0xff] %v298_v52  ;;  %301 = vst [vmem:[%s1855_s27 + $0x1a8] sm:$0xff] %v300_v53  ;;  %v302_v54 = vld [vmem:[%s1847_s26 + $0x360] sm:$0xff]  ;;  %v304_v55 = vld [vmem:[%s1847_s26 + $0x368] sm:$0xff] }
  0x2d   : > { %v306_v56 = vld [vmem:[%s1847_s26 + $0x380] sm:$0xff]  ;;  %303 = vst [vmem:[%s1855_s27 + $0x1b0] sm:$0xff] %v302_v54  ;;  %305 = vst [vmem:[%s1855_s27 + $0x1b8] sm:$0xff] %v304_v55  ;;  %v308_v57 = vld [vmem:[%s1847_s26 + $0x388] sm:$0xff] }
  0x2e   : > { %307 = vst [vmem:[%s1855_s27 + $0x1c0] sm:$0xff] %v306_v56  ;;  %v310_v58 = vld [vmem:[%s1847_s26 + $0x3a0] sm:$0xff]  ;;  %v312_v59 = vld [vmem:[%s1847_s26 + $0x3a8] sm:$0xff]  ;;  %309 = vst [vmem:[%s1855_s27 + $0x1c8] sm:$0xff] %v308_v57 }
  0x2f   : > { %311 = vst [vmem:[%s1855_s27 + $0x1d0] sm:$0xff] %v310_v58  ;;  %313 = vst [vmem:[%s1855_s27 + $0x1d8] sm:$0xff] %v312_v59  ;;  %v314_v60 = vld [vmem:[%s1847_s26 + $0x3c0] sm:$0xff]  ;;  %v316_v61 = vld [vmem:[%s1847_s26 + $0x3c8] sm:$0xff] }
  0x30   : > { %v318_v62 = vld [vmem:[%s1847_s26 + $0x3e0] sm:$0xff]  ;;  %315 = vst [vmem:[%s1855_s27 + $0x1e0] sm:$0xff] %v314_v60  ;;  %317 = vst [vmem:[%s1855_s27 + $0x1e8] sm:$0xff] %v316_v61  ;;  %v320_v63 = vld [vmem:[%s1847_s26 + $0x3e8] sm:$0xff] }
  0x31   : > { %319 = vst [vmem:[%s1855_s27 + $0x1f0] sm:$0xff] %v318_v62  ;;  %v322_v0 = vld [vmem:[%s1847_s26 + $0x400] sm:$0xff]  ;;  %v324_v1 = vld [vmem:[%s1847_s26 + $0x408] sm:$0xff]  ;;  %321 = vst [vmem:[%s1855_s27 + $0x1f8] sm:$0xff] %v320_v63 }
  0x32   : > { %323 = vst [vmem:[%s1855_s27 + $0x200] sm:$0xff] %v322_v0  ;;  %325 = vst [vmem:[%s1855_s27 + $0x208] sm:$0xff] %v324_v1  ;;  %v326_v2 = vld [vmem:[%s1847_s26 + $0x420] sm:$0xff]  ;;  %v328_v3 = vld [vmem:[%s1847_s26 + $0x428] sm:$0xff] }
  0x33   : > { %v330_v4 = vld [vmem:[%s1847_s26 + $0x440] sm:$0xff]  ;;  %327 = vst [vmem:[%s1855_s27 + $0x210] sm:$0xff] %v326_v2  ;;  %329 = vst [vmem:[%s1855_s27 + $0x218] sm:$0xff] %v328_v3  ;;  %v332_v5 = vld [vmem:[%s1847_s26 + $0x448] sm:$0xff] }
  0x34   : > { %331 = vst [vmem:[%s1855_s27 + $0x220] sm:$0xff] %v330_v4  ;;  %v334_v6 = vld [vmem:[%s1847_s26 + $0x460] sm:$0xff]  ;;  %v336_v7 = vld [vmem:[%s1847_s26 + $0x468] sm:$0xff]  ;;  %333 = vst [vmem:[%s1855_s27 + $0x228] sm:$0xff] %v332_v5 }
  0x35   : > { %335 = vst [vmem:[%s1855_s27 + $0x230] sm:$0xff] %v334_v6  ;;  %337 = vst [vmem:[%s1855_s27 + $0x238] sm:$0xff] %v336_v7  ;;  %v338_v8 = vld [vmem:[%s1847_s26 + $0x480] sm:$0xff]  ;;  %v340_v9 = vld [vmem:[%s1847_s26 + $0x488] sm:$0xff] }
  0x36   : > { %v342_v10 = vld [vmem:[%s1847_s26 + $0x4a0] sm:$0xff]  ;;  %339 = vst [vmem:[%s1855_s27 + $0x240] sm:$0xff] %v338_v8  ;;  %341 = vst [vmem:[%s1855_s27 + $0x248] sm:$0xff] %v340_v9  ;;  %v344_v11 = vld [vmem:[%s1847_s26 + $0x4a8] sm:$0xff] }
  0x37   : > { %343 = vst [vmem:[%s1855_s27 + $0x250] sm:$0xff] %v342_v10  ;;  %v346_v12 = vld [vmem:[%s1847_s26 + $0x4c0] sm:$0xff]  ;;  %v348_v13 = vld [vmem:[%s1847_s26 + $0x4c8] sm:$0xff]  ;;  %345 = vst [vmem:[%s1855_s27 + $0x258] sm:$0xff] %v344_v11 }
  0x38   : > { %347 = vst [vmem:[%s1855_s27 + $0x260] sm:$0xff] %v346_v12  ;;  %349 = vst [vmem:[%s1855_s27 + $0x268] sm:$0xff] %v348_v13  ;;  %v350_v14 = vld [vmem:[%s1847_s26 + $0x4e0] sm:$0xff]  ;;  %v352_v15 = vld [vmem:[%s1847_s26 + $0x4e8] sm:$0xff] }
  0x39   : > { %v354_v16 = vld [vmem:[%s1847_s26 + $0x500] sm:$0xff]  ;;  %351 = vst [vmem:[%s1855_s27 + $0x270] sm:$0xff] %v350_v14  ;;  %353 = vst [vmem:[%s1855_s27 + $0x278] sm:$0xff] %v352_v15  ;;  %v356_v17 = vld [vmem:[%s1847_s26 + $0x508] sm:$0xff] }
  0x3a   : > { %355 = vst [vmem:[%s1855_s27 + $0x280] sm:$0xff] %v354_v16  ;;  %v358_v18 = vld [vmem:[%s1847_s26 + $0x520] sm:$0xff]  ;;  %v360_v19 = vld [vmem:[%s1847_s26 + $0x528] sm:$0xff]  ;;  %357 = vst [vmem:[%s1855_s27 + $0x288] sm:$0xff] %v356_v17 }
  0x3b   : > { %359 = vst [vmem:[%s1855_s27 + $0x290] sm:$0xff] %v358_v18  ;;  %361 = vst [vmem:[%s1855_s27 + $0x298] sm:$0xff] %v360_v19  ;;  %v362_v20 = vld [vmem:[%s1847_s26 + $0x540] sm:$0xff]  ;;  %v364_v21 = vld [vmem:[%s1847_s26 + $0x548] sm:$0xff] }
  0x3c   : > { %v366_v22 = vld [vmem:[%s1847_s26 + $0x560] sm:$0xff]  ;;  %363 = vst [vmem:[%s1855_s27 + $0x2a0] sm:$0xff] %v362_v20  ;;  %365 = vst [vmem:[%s1855_s27 + $0x2a8] sm:$0xff] %v364_v21  ;;  %v368_v23 = vld [vmem:[%s1847_s26 + $0x568] sm:$0xff] }
  0x3d   : > { %367 = vst [vmem:[%s1855_s27 + $0x2b0] sm:$0xff] %v366_v22  ;;  %v370_v24 = vld [vmem:[%s1847_s26 + $0x580] sm:$0xff]  ;;  %v372_v25 = vld [vmem:[%s1847_s26 + $0x588] sm:$0xff]  ;;  %369 = vst [vmem:[%s1855_s27 + $0x2b8] sm:$0xff] %v368_v23 }
  0x3e   : > { %371 = vst [vmem:[%s1855_s27 + $0x2c0] sm:$0xff] %v370_v24  ;;  %373 = vst [vmem:[%s1855_s27 + $0x2c8] sm:$0xff] %v372_v25  ;;  %v374_v26 = vld [vmem:[%s1847_s26 + $0x5a0] sm:$0xff]  ;;  %v376_v27 = vld [vmem:[%s1847_s26 + $0x5a8] sm:$0xff] }
  0x3f   : > { %v378_v28 = vld [vmem:[%s1847_s26 + $0x5c0] sm:$0xff]  ;;  %375 = vst [vmem:[%s1855_s27 + $0x2d0] sm:$0xff] %v374_v26  ;;  %377 = vst [vmem:[%s1855_s27 + $0x2d8] sm:$0xff] %v376_v27  ;;  %v380_v29 = vld [vmem:[%s1847_s26 + $0x5c8] sm:$0xff] }
  0x40   : > { %379 = vst [vmem:[%s1855_s27 + $0x2e0] sm:$0xff] %v378_v28  ;;  %v382_v30 = vld [vmem:[%s1847_s26 + $0x5e0] sm:$0xff]  ;;  %v384_v31 = vld [vmem:[%s1847_s26 + $0x5e8] sm:$0xff]  ;;  %381 = vst [vmem:[%s1855_s27 + $0x2e8] sm:$0xff] %v380_v29 }
  0x41   : > { %383 = vst [vmem:[%s1855_s27 + $0x2f0] sm:$0xff] %v382_v30  ;;  %385 = vst [vmem:[%s1855_s27 + $0x2f8] sm:$0xff] %v384_v31 }
  0x42 PF: > { %p1439_p6 = scmp.ge.s32.totalorder %s1779_s16, 1  ;;  %p398_p7 = scmp.lt.s32.totalorder %s1779_s16, 3 }
  0x44   : > { %p399_p8 = pnand %p1439_p6, %p398_p7 }
  0x45   : > { %s405_s28 = sand.u32 (!%p399_p8), 1, %s1763_s12   ;;  %v2049_v32 = vld.sshfl [vmem:[%s2196_s0] sm:$0x13 pattern:$0x75316420] (!%p399_p8)  ;;  %v586_v33 = vlaneseq (!%p399_p8)  ;;  %s1440_s6 = sshll.u32 (!%p399_p8), %s1771_s14, 2 }
  0x46   : > { %402 = sbr.rel (%p399_p8) target bundleno = 395 (0x18b), region = 51  ;;  %v1781_v34 = vmov (!%p399_p8), 1966171168   ;;  %v582_v38 = vcombine.high (!%p399_p8), %v2049_v32, %v2049_v32  ;;  %p456_p9 = scmp.lt.s32.totalorder (!%p399_p8), %s1440_s6, 7 }
  0x47   : > { %s1552_s4 = smul.u32 (!%p399_p8), 768, %s405_s28  ;;  %v584_v35 = vunpack.c.l.s4 (!%p399_p8), %v1781_v34  ;;  %v2051_v36 = vshrl.u32 (!%p399_p8), %v586_v33, 7 }
  0x49   : > { %s2053_s5 = scalar_lea.vmem (!%p399_p8), [#allocation2], %s1552_s4  ;;  %v585_v39 = vunpack.c.0.s8 (!%p399_p8), %v584_v35 }
  0x4a   : > { %v1597_v37 = vld [vmem:[%s2053_s5 + $0x4] ss:$16 sps:$4 sm:$0xff] (!%p399_p8)   ;;  %v1599_v40 = vld [vmem:[%s2053_s5 + $0xc] ss:$16 sps:$4 sm:$0xff] (!%p399_p8)   ;;  %v1601_v41 = vld [vmem:[%s2053_s5] ss:$16 sps:$4 sm:$0xff] (!%p399_p8)  }
  0x4b   : > { %1081 = vmatprep.subr.bf16.mxu0 (!%p399_p8), %v1597_v37  ;;  %v1602_v42 = vld [vmem:[%s2053_s5 + $0x8] ss:$16 sps:$4 sm:$0xff] (!%p399_p8)   ;;  %v2062_v43 = vsub.s32 (!%p399_p8), %v585_v39, %v2051_v36  ;;  %1163 = vmatprep.subr.bf16.mxu1 (!%p399_p8), %v1599_v40  ;;  %v1603_v44 = vld [vmem:[%s2053_s5 + $0x24] ss:$16 sps:$4 sm:$0xff] (!%p399_p8)   ;;  %v1605_v45 = vld [vmem:[%s2053_s5 + $0x2c] ss:$16 sps:$4 sm:$0xff] (!%p399_p8)  }
  0x4c   : > { %1082 = vmatpush1.bf16.msra.mxu0 (!%p399_p8), %v1601_v41  ;;  %1164 = vmatpush1.bf16.msra.mxu1 (!%p399_p8), %v1602_v42  ;;  %v1607_v46 = vld [vmem:[%s2053_s5 + $0x20] ss:$16 sps:$4 sm:$0xff] (!%p399_p8)   ;;  %v1608_v48 = vld [vmem:[%s2053_s5 + $0x28] ss:$16 sps:$4 sm:$0xff] (!%p399_p8)   ;;  %v1609_v49 = vld [vmem:[%s2053_s5 + $0x44] ss:$16 sps:$4 sm:$0xff] (!%p399_p8)  }
  0x4d   : > { %v596_v47 = vrot.slane %v582_v38, %v2062_v43  ;;  %1083 = vmatprep.subr.bf16.mxu0 %v1603_v44  ;;  %1165 = vmatprep.subr.bf16.mxu1 %v1605_v45  ;;  %v1611_v50 = vld [vmem:[%s2053_s5 + $0x4c] ss:$16 sps:$4 sm:$0xff]   ;;  %v1613_v51 = vld [vmem:[%s2053_s5 + $0x40] ss:$16 sps:$4 sm:$0xff]   ;;  %v1614_v52 = vld [vmem:[%s2053_s5 + $0x48] ss:$16 sps:$4 sm:$0xff]  }
  0x4e   : > { %v1615_v53 = vld [vmem:[%s2053_s5 + $0x64] ss:$16 sps:$4 sm:$0xff]   ;;  %v1617_v54 = vld [vmem:[%s2053_s5 + $0x6c] ss:$16 sps:$4 sm:$0xff]   ;;  %v1619_v55 = vld [vmem:[%s2053_s5 + $0x60] ss:$16 sps:$4 sm:$0xff]  }
  0x4f   : > { %1113 = vmatprep.mubr.bf16.mxu0 %v596_v47  ;;  %1195 = vmatprep.mubr.bf16.mxu1 %v596_v47  ;;  %v1620_v56 = vld [vmem:[%s2053_s5 + $0x68] ss:$16 sps:$4 sm:$0xff]   ;;  %v1621_v57 = vld [vmem:[%s2053_s5 + $0x84] ss:$16 sps:$4 sm:$0xff]   ;;  %v1623_v58 = vld [vmem:[%s2053_s5 + $0x8c] ss:$16 sps:$4 sm:$0xff]  }
  0x50   : > { %1084 = vmatpush1.bf16.msra.mxu0 %v1607_v46  ;;  %1166 = vmatpush1.bf16.msra.mxu1 %v1608_v48  ;;  %v1625_v59 = vld [vmem:[%s2053_s5 + $0x80] ss:$16 sps:$4 sm:$0xff]   ;;  %v1626_v60 = vld [vmem:[%s2053_s5 + $0x88] ss:$16 sps:$4 sm:$0xff]   ;;  %v1627_v61 = vld [vmem:[%s2053_s5 + $0xa4] ss:$16 sps:$4 sm:$0xff]   ;;  %v2129_v46 = vrot.slane %v2049_v32, %v2062_v43 }
  0x51   : > { %1085 = vmatprep.subr.bf16.mxu0 %v1609_v49  ;;  %1167 = vmatprep.subr.bf16.mxu1 %v1611_v50  ;;  %v1629_v62 = vld [vmem:[%s2053_s5 + $0xac] ss:$16 sps:$4 sm:$0xff]   ;;  %v1631_v63 = vld [vmem:[%s2053_s5 + $0xa0] ss:$16 sps:$4 sm:$0xff]   ;;  %v1632_v0 = vld [vmem:[%s2053_s5 + $0xa8] ss:$16 sps:$4 sm:$0xff]  }
  0x52   : > { %v1633_v1 = vld [vmem:[%s2053_s5 + $0xc4] ss:$16 sps:$4 sm:$0xff]   ;;  %v1635_v2 = vld [vmem:[%s2053_s5 + $0xcc] ss:$16 sps:$4 sm:$0xff]   ;;  %v1637_v3 = vld [vmem:[%s2053_s5 + $0xc0] ss:$16 sps:$4 sm:$0xff]  }
  0x53   : > { %v1638_v4 = vld [vmem:[%s2053_s5 + $0xc8] ss:$16 sps:$4 sm:$0xff]   ;;  %v1639_v5 = vld [vmem:[%s2053_s5 + $0xe4] ss:$16 sps:$4 sm:$0xff]   ;;  %v1641_v6 = vld [vmem:[%s2053_s5 + $0xec] ss:$16 sps:$4 sm:$0xff]  }
  0x54   : > { %1086 = vmatpush1.bf16.msra.mxu0 %v1613_v51  ;;  %1168 = vmatpush1.bf16.msra.mxu1 %v1614_v52  ;;  %v1643_v7 = vld [vmem:[%s2053_s5 + $0xe0] ss:$16 sps:$4 sm:$0xff]   ;;  %v1644_v8 = vld [vmem:[%s2053_s5 + $0xe8] ss:$16 sps:$4 sm:$0xff]   ;;  %v1645_v9 = vld [vmem:[%s2053_s5 + $0x104] ss:$16 sps:$4 sm:$0xff]  }
  0x55   : > { %1087 = vmatprep.subr.bf16.mxu0 %v1615_v53  ;;  %1169 = vmatprep.subr.bf16.mxu1 %v1617_v54  ;;  %v1647_v10 = vld [vmem:[%s2053_s5 + $0x10c] ss:$16 sps:$4 sm:$0xff]   ;;  %v1649_v11 = vld [vmem:[%s2053_s5 + $0x100] ss:$16 sps:$4 sm:$0xff]   ;;  %v1650_v12 = vld [vmem:[%s2053_s5 + $0x108] ss:$16 sps:$4 sm:$0xff]  }
  0x56   : > { %v1651_v13 = vld [vmem:[%s2053_s5 + $0x124] ss:$16 sps:$4 sm:$0xff]   ;;  %v1653_v14 = vld [vmem:[%s2053_s5 + $0x12c] ss:$16 sps:$4 sm:$0xff]   ;;  %v1655_v15 = vld [vmem:[%s2053_s5 + $0x120] ss:$16 sps:$4 sm:$0xff]  }
  0x57   : > { %v1656_v16 = vld [vmem:[%s2053_s5 + $0x128] ss:$16 sps:$4 sm:$0xff]   ;;  %v1657_v17 = vld [vmem:[%s2053_s5 + $0x144] ss:$16 sps:$4 sm:$0xff]   ;;  %v1659_v18 = vld [vmem:[%s2053_s5 + $0x14c] ss:$16 sps:$4 sm:$0xff]  }
  0x58   : > { %1088 = vmatpush1.bf16.msra.mxu0 %v1619_v55  ;;  %1170 = vmatpush1.bf16.msra.mxu1 %v1620_v56  ;;  %v1661_v19 = vld [vmem:[%s2053_s5 + $0x140] ss:$16 sps:$4 sm:$0xff]   ;;  %v1662_v20 = vld [vmem:[%s2053_s5 + $0x148] ss:$16 sps:$4 sm:$0xff]   ;;  %v1663_v21 = vld [vmem:[%s2053_s5 + $0x164] ss:$16 sps:$4 sm:$0xff]  }
  0x59   : > { %1089 = vmatprep.subr.bf16.mxu0 %v1621_v57  ;;  %1171 = vmatprep.subr.bf16.mxu1 %v1623_v58  ;;  %v1665_v22 = vld [vmem:[%s2053_s5 + $0x16c] ss:$16 sps:$4 sm:$0xff]   ;;  %v1667_v23 = vld [vmem:[%s2053_s5 + $0x160] ss:$16 sps:$4 sm:$0xff]   ;;  %v1668_v24 = vld [vmem:[%s2053_s5 + $0x168] ss:$16 sps:$4 sm:$0xff]  }
  0x5a   : > { %v1669_v25 = vld [vmem:[%s2053_s5 + $0x184] ss:$16 sps:$4 sm:$0xff]   ;;  %v1671_v26 = vld [vmem:[%s2053_s5 + $0x18c] ss:$16 sps:$4 sm:$0xff]   ;;  %v1673_v27 = vld [vmem:[%s2053_s5 + $0x180] ss:$16 sps:$4 sm:$0xff]  }
  0x5b   : > { %v1674_v28 = vld [vmem:[%s2053_s5 + $0x188] ss:$16 sps:$4 sm:$0xff]   ;;  %v1675_v29 = vld [vmem:[%s2053_s5 + $0x1a4] ss:$16 sps:$4 sm:$0xff]   ;;  %v1677_v30 = vld [vmem:[%s2053_s5 + $0x1ac] ss:$16 sps:$4 sm:$0xff]  }
  0x5c   : > { %1090 = vmatpush1.bf16.msra.mxu0 %v1625_v59  ;;  %1172 = vmatpush1.bf16.msra.mxu1 %v1626_v60  ;;  %v1679_v31 = vld [vmem:[%s2053_s5 + $0x1a0] ss:$16 sps:$4 sm:$0xff]   ;;  %v1680_v33 = vld [vmem:[%s2053_s5 + $0x1a8] ss:$16 sps:$4 sm:$0xff]   ;;  %v1681_v34 = vld [vmem:[%s2053_s5 + $0x1c4] ss:$16 sps:$4 sm:$0xff]  }
  0x5d   : > { %1091 = vmatprep.subr.bf16.mxu0 %v1627_v61  ;;  %1173 = vmatprep.subr.bf16.mxu1 %v1629_v62  ;;  %v1683_v35 = vld [vmem:[%s2053_s5 + $0x1cc] ss:$16 sps:$4 sm:$0xff]   ;;  %v1685_v37 = vld [vmem:[%s2053_s5 + $0x1c0] ss:$16 sps:$4 sm:$0xff]   ;;  %v1686_v38 = vld [vmem:[%s2053_s5 + $0x1c8] ss:$16 sps:$4 sm:$0xff]  }
  0x5e   : > { %v1687_v39 = vld [vmem:[%s2053_s5 + $0x1e4] ss:$16 sps:$4 sm:$0xff]   ;;  %v1689_v40 = vld [vmem:[%s2053_s5 + $0x1ec] ss:$16 sps:$4 sm:$0xff]   ;;  %v1691_v41 = vld [vmem:[%s2053_s5 + $0x1e0] ss:$16 sps:$4 sm:$0xff]  }
  0x5f   : > { %v1692_v42 = vld [vmem:[%s2053_s5 + $0x1e8] ss:$16 sps:$4 sm:$0xff]   ;;  %v1695_v44 = vld [vmem:[%s2053_s5 + $0x204] ss:$16 sps:$4 sm:$0xff]   ;;  %v1698_v45 = vld [vmem:[%s2053_s5 + $0x20c] ss:$16 sps:$4 sm:$0xff]  }
  0x60   : > { %1092 = vmatpush1.bf16.msra.mxu0 %v1631_v63  ;;  %1174 = vmatpush1.bf16.msra.mxu1 %v1632_v0  ;;  %v1693_v47 = vld [vmem:[%s2053_s5 + $0x200] ss:$16 sps:$4 sm:$0xff]   ;;  %v1696_v48 = vld [vmem:[%s2053_s5 + $0x208] ss:$16 sps:$4 sm:$0xff]   ;;  %v1701_v49 = vld [vmem:[%s2053_s5 + $0x224] ss:$16 sps:$4 sm:$0xff]  }
  0x61   : > { %1093 = vmatprep.subr.bf16.mxu0 %v1633_v1  ;;  %1175 = vmatprep.subr.bf16.mxu1 %v1635_v2  ;;  %v1704_v50 = vld [vmem:[%s2053_s5 + $0x22c] ss:$16 sps:$4 sm:$0xff]   ;;  %v1699_v32 = vld [vmem:[%s2053_s5 + $0x220] ss:$16 sps:$4 sm:$0xff]   ;;  %v1702_v43 = vld [vmem:[%s2053_s5 + $0x228] ss:$16 sps:$4 sm:$0xff]  }
  0x62   : > { %v1707_v51 = vld [vmem:[%s2053_s5 + $0x244] ss:$16 sps:$4 sm:$0xff]   ;;  %v1710_v52 = vld [vmem:[%s2053_s5 + $0x24c] ss:$16 sps:$4 sm:$0xff]   ;;  %v1782_v53 = vmov 0   ;;  %s2207_s6 = smov (!%p456_p9, %s1440_s6), 7 }
  0x63   : > { %v1705_v54 = vld [vmem:[%s2053_s5 + $0x240] ss:$16 sps:$4 sm:$0xff]   ;;  %v1708_v55 = vld [vmem:[%s2053_s5 + $0x248] ss:$16 sps:$4 sm:$0xff]   ;;  %v1713_v56 = vld [vmem:[%s2053_s5 + $0x264] ss:$16 sps:$4 sm:$0xff]   ;;  %s458_s9 = scalar_lea.vmem %s2198_s2, %s2207_s6 }
  0x64   : > { %1094 = vmatpush1.bf16.msra.mxu0 %v1637_v3  ;;  %1176 = vmatpush1.bf16.msra.mxu1 %v1638_v4  ;;  %v1716_v57 = vld [vmem:[%s2053_s5 + $0x26c] ss:$16 sps:$4 sm:$0xff]   ;;  %v1711_v58 = vld [vmem:[%s2053_s5 + $0x260] ss:$16 sps:$4 sm:$0xff]   ;;  %v1714_v59 = vld [vmem:[%s2053_s5 + $0x268] ss:$16 sps:$4 sm:$0xff]  }
  0x65   : > { %1095 = vmatprep.subr.bf16.mxu0 %v1639_v5  ;;  %1177 = vmatprep.subr.bf16.mxu1 %v1641_v6  ;;  %v1719_v60 = vld [vmem:[%s2053_s5 + $0x284] ss:$16 sps:$4 sm:$0xff]   ;;  %v1722_v61 = vld [vmem:[%s2053_s5 + $0x28c] ss:$16 sps:$4 sm:$0xff]   ;;  %v1717_v62 = vld [vmem:[%s2053_s5 + $0x280] ss:$16 sps:$4 sm:$0xff]  }
  0x66   : > { %v1720_v63 = vld [vmem:[%s2053_s5 + $0x288] ss:$16 sps:$4 sm:$0xff]   ;;  %v1725_v0 = vld [vmem:[%s2053_s5 + $0x2a4] ss:$16 sps:$4 sm:$0xff]   ;;  %v1728_v1 = vld [vmem:[%s2053_s5 + $0x2ac] ss:$16 sps:$4 sm:$0xff]  }
  0x67   : > { %v1723_v2 = vld [vmem:[%s2053_s5 + $0x2a0] ss:$16 sps:$4 sm:$0xff]   ;;  %v1726_v3 = vld [vmem:[%s2053_s5 + $0x2a8] ss:$16 sps:$4 sm:$0xff]   ;;  %v1731_v4 = vld [vmem:[%s2053_s5 + $0x2c4] ss:$16 sps:$4 sm:$0xff]  }
  0x68   : > { %1096 = vmatpush1.bf16.msra.mxu0 %v1643_v7  ;;  %1178 = vmatpush1.bf16.msra.mxu1 %v1644_v8  ;;  %v1734_v5 = vld [vmem:[%s2053_s5 + $0x2cc] ss:$16 sps:$4 sm:$0xff]   ;;  %v1729_v6 = vld [vmem:[%s2053_s5 + $0x2c0] ss:$16 sps:$4 sm:$0xff]   ;;  %v1732_v7 = vld [vmem:[%s2053_s5 + $0x2c8] ss:$16 sps:$4 sm:$0xff]  }
  0x69   : > { %1097 = vmatprep.subr.bf16.mxu0 %v1645_v9  ;;  %1179 = vmatprep.subr.bf16.mxu1 %v1647_v10  ;;  %v1737_v8 = vld [vmem:[%s2053_s5 + $0x2e4] ss:$16 sps:$4 sm:$0xff]   ;;  %v1740_v9 = vld [vmem:[%s2053_s5 + $0x2ec] ss:$16 sps:$4 sm:$0xff]   ;;  %v1735_v10 = vld [vmem:[%s2053_s5 + $0x2e0] ss:$16 sps:$4 sm:$0xff]  }
  0x6a   : > { %s1442_s10 = sshll.u32 %s2207_s6, 1 }
  0x6b   : > { %s468_s14 = scalar_lea.vmem %s2199_s3, %s1442_s10 }
  0x6c   : > { %1098 = vmatpush1.bf16.msra.mxu0 %v1649_v11  ;;  %1180 = vmatpush1.bf16.msra.mxu1 %v1650_v12  ;;  %v1738_v11 = vld [vmem:[%s2053_s5 + $0x2e8] ss:$16 sps:$4 sm:$0xff]   ;;  %v597_v12 = vcombine.high %v2129_v46, %v2129_v46 }
  0x6d   : > { %1099 = vmatprep.subr.bf16.mxu0 %v1651_v13  ;;  %1181 = vmatprep.subr.bf16.mxu1 %v1653_v14  ;;  %v1277_v13 = vsub.s32 0, %v2051_v36  ;;  %v1281_v14 = vsub.s32 1, %v2051_v36 }
  0x70   : > { %1100 = vmatpush1.bf16.msra.mxu0 %v1655_v15  ;;  %1182 = vmatpush1.bf16.msra.mxu1 %v1656_v16  ;;  %v1285_v15 = vsub.s32 2, %v2051_v36  ;;  %v1289_v16 = vsub.s32 3, %v2051_v36 }
  0x71   : > { %1101 = vmatprep.subr.bf16.mxu0 %v1657_v17  ;;  %1183 = vmatprep.subr.bf16.mxu1 %v1659_v18  ;;  %v1273_v17 = vld [vmem:[%s458_s9] sm:$0xf]  ;;  %v1783_v18 = vmov 1983009808  }
  0x74   : > { %1102 = vmatpush1.bf16.msra.mxu0 %v1661_v19  ;;  %1184 = vmatpush1.bf16.msra.mxu1 %v1662_v20  ;;  %v1252_v19 = vunpack.c.l.s4 %v1783_v18  ;;  %v1278_v20 = vrot.slane %v1273_v17, %v1277_v13 }
  0x75   : > { %1103 = vmatprep.subr.bf16.mxu0 %v1663_v21  ;;  %1185 = vmatprep.subr.bf16.mxu1 %v1665_v22  ;;  %v1282_v21 = vrot.slane %v1273_v17, %v1281_v14  ;;  %v1286_v22 = vrot.slane %v1273_v17, %v1285_v15 }
  0x78   : > { %1104 = vmatpush1.bf16.msra.mxu0 %v1667_v23  ;;  %1186 = vmatpush1.bf16.msra.mxu1 %v1668_v24  ;;  %v1290_v23 = vrot.slane %v1273_v17, %v1289_v16  ;;  %v1253_v24 = vunpack.c.0.s8 %v1252_v19 }
  0x79   : > { %1105 = vmatprep.subr.bf16.mxu0 %v1669_v25  ;;  %1187 = vmatprep.subr.bf16.mxu1 %v1671_v26  ;;  %v1291_v25 = vcombine.low %v1278_v20, %v1282_v21 }
  0x7a   : > { %v1292_v26 = vcombine.low %v1286_v22, %v1290_v23 }
  0x7c   : > { %1106 = vmatpush1.bf16.msra.mxu0 %v1673_v27  ;;  %1188 = vmatpush1.bf16.msra.mxu1 %v1674_v28 }
  0x7d   : > { %1107 = vmatprep.subr.bf16.mxu0 %v1675_v29  ;;  %1189 = vmatprep.subr.bf16.mxu1 %v1677_v30  ;;  %v1256_v29 = vsub.s32 %v1253_v24, %v2051_v36 }
  0x80   : > { %1108 = vmatpush1.bf16.msra.mxu0 %v1679_v31  ;;  %1190 = vmatpush1.bf16.msra.mxu1 %v1680_v33 }
  0x81   : > { %1109 = vmatprep.subr.bf16.mxu0 %v1681_v34  ;;  %1191 = vmatprep.subr.bf16.mxu1 %v1683_v35  ;;  %v1299_v35 = vrot.slane %v1291_v25, %v1256_v29 }
  0x84   : > { %1110 = vmatpush1.bf16.msra.mxu0 %v1685_v37  ;;  %1192 = vmatpush1.bf16.msra.mxu1 %v1686_v38  ;;  %v1306_v37 = vrot.slane %v1292_v26, %v1256_v29 }
  0x85   : > { %1111 = vmatprep.subr.bf16.mxu0 %v1687_v39  ;;  %1193 = vmatprep.subr.bf16.mxu1 %v1689_v40 }
  0x88   : > { %1112 = vmatpush1.bf16.msra.mxu0 %v1691_v41  ;;  %1194 = vmatpush1.bf16.msra.mxu1 %v1692_v42 }
  0x89   : > { %1122 = vmatprep.subr.bf16.mxu0 %v1695_v44  ;;  %1204 = vmatprep.subr.bf16.mxu1 %v1698_v45 }
  0x8b   : > { %1114 = vmatmul.mubr.bf16.vlgmr.msra.gmra.mrb[0].mxu0 %v2129_v46  ;;  %1196 = vmatmul.mubr.bf16.vlgmr.msra.gmra.mrb[0].mxu1 %v2129_v46  ;;  %v1307_v46 = vcombine.low %v1299_v35, %v1306_v37 }
  0x8c   : > { %1123 = vmatpush1.bf16.msra.mxu0 %v1693_v47  ;;  %1205 = vmatpush1.bf16.msra.mxu1 %v1696_v48 }
  0x8d   : > { %1124 = vmatprep.subr.bf16.mxu0 %v1701_v49  ;;  %1206 = vmatprep.subr.bf16.mxu1 %v1704_v50 }
  0x8e   : > { %1154 = vmatprep.mubr.bf16.mxu0 %v1782_v53  ;;  %1236 = vmatprep.mubr.bf16.mxu1 %v1782_v53 }
  0x90   : > { %1125 = vmatpush1.bf16.msra.mxu0 %v1699_v32  ;;  %1207 = vmatpush1.bf16.msra.mxu1 %v1702_v43 }
  0x91   : > { %1126 = vmatprep.subr.bf16.mxu0 %v1707_v51  ;;  %1208 = vmatprep.subr.bf16.mxu1 %v1710_v52 }
  0x94   : > { %1127 = vmatpush1.bf16.msra.mxu0 %v1705_v54  ;;  %1209 = vmatpush1.bf16.msra.mxu1 %v1708_v55 }
  0x95   : > { %1128 = vmatprep.subr.bf16.mxu0 %v1713_v56  ;;  %1210 = vmatprep.subr.bf16.mxu1 %v1716_v57 }
  0x98   : > { %1129 = vmatpush1.bf16.msra.mxu0 %v1711_v58  ;;  %1211 = vmatpush1.bf16.msra.mxu1 %v1714_v59 }
  0x99   : > { %1130 = vmatprep.subr.bf16.mxu0 %v1719_v60  ;;  %1212 = vmatprep.subr.bf16.mxu1 %v1722_v61 }
  0x9c   : > { %1131 = vmatpush1.bf16.msra.mxu0 %v1717_v62  ;;  %1213 = vmatpush1.bf16.msra.mxu1 %v1720_v63 }
  0x9d   : > { %1132 = vmatprep.subr.bf16.mxu0 %v1725_v0  ;;  %1214 = vmatprep.subr.bf16.mxu1 %v1728_v1 }
  0xa0   : > { %1133 = vmatpush1.bf16.msra.mxu0 %v1723_v2  ;;  %1215 = vmatpush1.bf16.msra.mxu1 %v1726_v3 }
  0xa1   : > { %1134 = vmatprep.subr.bf16.mxu0 %v1731_v4  ;;  %1216 = vmatprep.subr.bf16.mxu1 %v1734_v5 }
  0xa4   : > { %1135 = vmatpush1.bf16.msra.mxu0 %v1729_v6  ;;  %1217 = vmatpush1.bf16.msra.mxu1 %v1732_v7 }
  0xa5   : > { %1136 = vmatprep.subr.bf16.mxu0 %v1737_v8  ;;  %1218 = vmatprep.subr.bf16.mxu1 %v1740_v9 }
  0xa8   : > { %1137 = vmatpush1.bf16.msra.mxu0 %v1735_v10  ;;  %1219 = vmatpush1.bf16.msra.mxu1 %v1738_v11 }
  0xab   : > { %1155 = vmatmul.mubr.bf16.vlgmr.msra.gmra.mrb[0].mxu0 %v597_v12  ;;  %1237 = vmatmul.mubr.bf16.vlgmr.msra.gmra.mrb[0].mxu1 %v597_v12 }
 0x17e   : > { %v1156_v27 = vpop.f32.mrb[0].mxu0  ;;  %v1238_v28 = vpop.f32.mrb[0].mxu1 }
 0x17f   : > { %v1158_v30 = vpop.f32.mrb[1].mxu0  ;;  %v1240_v31 = vpop.f32.mrb[1].mxu1 }
 0x180   : > { %v1249_v33 = vcombine.low %v1156_v27, %v1158_v30  ;;  %v1250_v34 = vcombine.low %v1238_v28, %v1240_v31  ;;  %v1160_v38 = vpop.f32.mrb[2].mxu0  ;;  %v1242_v39 = vpop.f32.mrb[2].mxu1 }
 0x181   : > { %v1161_v40 = vpop.f32.mrb[3].mxu0  ;;  %v1243_v41 = vpop.f32.mrb[3].mxu1 }
 0x182   : > { %v1257_v42 = vrot.slane %v1249_v33, %v1256_v29  ;;  %v1264_v44 = vrot.slane %v1250_v34, %v1256_v29 }
 0x184   : > { %v1265_v45 = vcombine.low %v1257_v42, %v1264_v44 }
 0x186   : > { %v1309_v47 = vadd.f32 %v1307_v46, %v1265_v45 }
 0x188   : > { %v1310_v36 = vmax.f32 %v1309_v47, 0.0 }
 0x18a   : > { %1311 = vst [vmem:[%s468_s14] sm:$0xff] %v1310_v36 }
 0x18b PF: > { %s13_s16 = sadd.s32 1, %s1779_s16   ;;  %s2200_s12 = smov %s1767_s13 }
 0x18c   : > { %p10_p10 = scmp.ge.s32.totalorder %s13_s16, 4   ;;  %s2201_s13 = smov %s1839_s20 }
 0x18d   : > { %s2202_s14 = smov %s1775_s15  ;;  %s2203_s15 = smov %s2205_s17 }
 0x18e   :  { %12 = sbr.rel (!%p10_p10) target bundleno = 3 (0x3), region = 104 }

// kernel: spex_forward.2
= control target key start
LH: loop header
LB: loop body
LE: loop exit
PB: predicated region body
PF: predicated region fallthrough
CT: control target
= control target key end

     0   :  { %8 = vsyncpa [#allocation3], 0  ;;  %s1878_s0 = inlined_call_operand.vmem [shape: bf16[2,1024], index: 0, kind: input, shape index: {}]   ;;  %s1879_s1 = inlined_call_operand.hbm [shape: bf16[1024,384], index: 1, kind: input, shape index: {}]   ;;  %s1880_s2 = inlined_call_operand.hbm [shape: f32[1,384], index: 2, kind: input, shape index: {}]   ;;  %s1881_s3 = inlined_call_operand.vmem [shape: f32[2,384], index: 3, kind: output, shape index: {}]  }
   0x1   :  { %10 = vsyncpa [#allocation3 + $0x1], 0 }
   0x2   :  { %11 = vsyncpa [#allocation5], 0 }
   0x3   :  { %13 = vsyncpa [#allocation5 + $0x1], 0  ;;  %s1615_s12 = smov 0   ;;  %s1617_s13 = smov 0  }
   0x4   :  { %s1619_s14 = smov 0   ;;  %s1621_s15 = smov 0  }
   0x5   :  { %s1623_s16 = smov 0   ;;  %s1625_s17 = smov 0  }
   0x6 LB: > { %s1176_s18 = sadd.s32 4294967295, %s1586_s17   ;;  %s34_s19 = sadd.s32 1, %s1582_s16  ;;  %s1586_s17 = sphi %s1625_s17, %s19_s17   ;;  %s1582_s16 = sphi %s1623_s16, %s1894_s16   ;;  %s1578_s15 = sphi %s1621_s15, %s1893_s15   ;;  %s1574_s14 = sphi %s1619_s14, %s1892_s14   ;;  %s1570_s13 = sphi %s1617_s13, %s1891_s13   ;;  %s1566_s12 = sphi %s1615_s12, %s1890_s12  }
   0x7   : > { %p36_p0 = scmp.ge.s32.totalorder %s34_s19, 3  ;;  %s75_s20 = sadd.s32 1, %s1574_s14 }
   0x8   : > { %p82_p1 = scmp.ne.s32.totalorder %s1574_s14, %s1570_s13  ;;  %p83_p2 = scmp.eq.s32.totalorder %s1586_s17, 0 }
   0x9   : > { %s1896_s19 = smov (%p36_p0, %s34_s19), 0  ;;  %p88_p4 = scmp.ne.s32.totalorder %s1570_s13, %s1566_s12 }
   0xa   : > { %p1651_p3 = por %p83_p2, %p82_p1  ;;  %s71_s22 = ssub.s32 %s1582_s16, %s1896_s19 }
   0xb   : > { %p89_p5 = scmp.eq.s32.totalorder %s1176_s18, 0  ;;  %p73_p6 = scmp.eq.s32.totalorder %s71_s22, 0 }
   0xc   : > { %p1353_p8 = scmp.lt.s32.totalorder %s1586_s17, 3  ;;  %s1667_s25 = sand.u32 1, %s1574_s14  }
   0xd   : > { %p1658_p7 = por %p89_p5, %p88_p4  ;;  %s1182_s26 = sshll.u32 %s1582_s16, 6 }
   0xe   : > { %s1664_s24 = scalar_select %p73_p6, %s1574_s14, %s75_s20  }
   0xf   : > { %s1884_s23 = scalar_select %p1658_p7, 1, 0 }
  0x10   : > { %s1181_s27 = sshll.u32 %s1667_s25, 9  ;;  %s1674_s30 = scalar_lea.hbm %s1879_s1, %s1182_s26 }
  0x11   : > { %s182_s4 = scalar_lea.vmem [#allocation2], %s1181_s27  ;;  %p1678_p9 = pnand %p1353_p8, %p1651_p3 }
  0x12   : > { %s191_s5 = sshll.u32 %s182_s4, 4  ;;  %s179_s7 = scalar_lea.sflag [#allocation3], %s1667_s25  ;;  %s1682_s5 = int_to_ptr.vmem [resolvable:$true] %s191_s5 }
  0x13   : > { %s1472_s8 = scalar_lea.hbm %s1674_s30, 8192  ;;  %p1474_p12 = pneg %p1678_p9 }
  0x14   : > { %p1473_p11 = scmp.ne.s32.totalorder %s1674_s30, %s1472_s8  ;;  %s1477_s11 = scalar_lea.hbm %s1879_s1, 24576 }
  0x15   : > { %p1478_p1 = scmp.lt.u32.totalorder %s1674_s30, %s1879_s1  ;;  %p1479_p2 = scmp.lt.u32.totalorder %s1477_s11, %s1472_s8 }
  0x16   : > { %p1475_p13 = pnand %p1474_p12, %p1473_p11  ;;  %p1481_p4 = scmp.lt.u32.totalorder %s1472_s8, %s1674_s30 }
  0x17   : > { %p1480_p3 = por %p1479_p2, %p1478_p1 }
  0x18   : > { %p1476_p0 = pneg %p1475_p13 }
  0x19   : > { %p1482_p5 = por %p1481_p4, %p1480_p3 }
  0x1b   : > { %p1483_p6 = pnand %p1482_p5, %p1476_p0 }
  0x1d   : > { %1486 = shalt.err (!%p1483_p6)
}
  0x1e   : > { %s1487_s20 = scalar_lea.vmem %s1682_s5, 8192  ;;  %s1588_s21 = smov [#allocation2]  }
  0x1f   : > { %p1488_p8 = scmp.ne.s32.totalorder %s1682_s5, %s1487_s20  ;;  %s1492_s22 = sshll.u32 %s1588_s21, 4  ;;  %s1493_s22 = int_to_ptr.vmem [resolvable:$false] %s1492_s22 }
  0x20   : > { %s1494_s26 = scalar_lea.vmem %s1493_s22, 16384  ;;  %p1495_p10 = scmp.lt.s32.totalorder %s1682_s5, %s1493_s22 }
  0x21   : > { %p1490_p11 = pnand %p1488_p8, %p1474_p12  ;;  %p1496_p1 = scmp.lt.s32.totalorder %s1494_s26, %s1487_s20 }
  0x23   : > { %p1491_p13 = pneg %p1490_p11  ;;  %p1497_p2 = por %p1496_p1, %p1495_p10 }
  0x25   : > { %p1498_p3 = pnand %p1497_p2, %p1491_p13 }
  0x27   : > { %1501 = shalt.err (!%p1498_p3)
}
  0x28   : > { %s1589_s27 = smov 192   ;;  %s1590_s28 = smov 64  }
  0x29   : > { %s1591_s29 = smov 4   ;;  %p216_p0 = scmp.lt.s32.totalorder %s1586_s17, 4 }
  0x2a   : > { %1349 = dma.hbm_to_vmem [thread:$0]  (!%p1678_p9), %s1674_s30, 8192, %s1682_s5, %s179_s7, %s1589_s27, %s1590_s28, %s1591_s29  }
  0x2b   : > { %s1183_s4 = sshll.u32 %s1582_s16, 4  ;;  %p1886_p10 = scmp.ge.s32.totalorder %s1586_s17, 1 }
  0x2c   : > { %s1724_s11 = scalar_lea.hbm %s1880_s2, %s1183_s4  ;;  %s204_s12 = scalar_lea.vmem [#allocation4], %s1667_s25 }
  0x2d   : > { %p1717_p4 = pnand %p1886_p10, %p216_p0  ;;  %s211_s18 = sshll.u32 %s204_s12, 4  ;;  %s212_s18 = int_to_ptr.vmem [resolvable:$true] %s211_s18 }
  0x2e   : > { %s202_s30 = scalar_lea.sflag [#allocation5], %s1667_s25  ;;  %s1502_s5 = scalar_lea.hbm %s1724_s11, 16 }
  0x2f   : > { %s1887_s8 = scalar_select %p1717_p4, 1, 0 }
  0x30   : > { %p1503_p5 = scmp.ne.s32.totalorder %s1724_s11, %s1502_s5  ;;  %s1507_s21 = scalar_lea.hbm %s1880_s2, 48 }
  0x31   : > { %p1508_p11 = scmp.lt.u32.totalorder %s1724_s11, %s1880_s2  ;;  %p1509_p13 = scmp.lt.u32.totalorder %s1507_s21, %s1502_s5 }
  0x32   : > { %p1505_p6 = pnand %p1503_p5, %p1474_p12  ;;  %p1511_p2 = scmp.lt.u32.totalorder %s1502_s5, %s1724_s11 }
  0x33   : > { %p1510_p1 = por %p1509_p13, %p1508_p11 }
  0x34   : > { %p1506_p8 = pneg %p1505_p6 }
  0x35   : > { %p1512_p3 = por %p1511_p2, %p1510_p1 }
  0x37   : > { %p1513_p0 = pnand %p1512_p3, %p1506_p8 }
  0x39   : > { %1516 = shalt.err (!%p1513_p0)
}
  0x3a   : > { %s1517_s25 = scalar_lea.vmem %s212_s18, 16  ;;  %s1592_s27 = smov [#allocation4]  }
  0x3b   : > { %p1518_p10 = scmp.ne.s32.totalorder %s212_s18, %s1517_s25  ;;  %s1522_s28 = sshll.u32 %s1592_s27, 4  ;;  %s1523_s28 = int_to_ptr.vmem [resolvable:$false] %s1522_s28 }
  0x3c   : > { %s1524_s29 = scalar_lea.vmem %s1523_s28, 32  ;;  %p1525_p7 = scmp.lt.s32.totalorder %s212_s18, %s1523_s28 }
  0x3d   : > { %p1520_p5 = pnand %p1518_p10, %p1474_p12  ;;  %p1526_p4 = scmp.lt.s32.totalorder %s1524_s29, %s1517_s25 }
  0x3f   : > { %p1521_p6 = pneg %p1520_p5  ;;  %p1527_p11 = por %p1526_p4, %p1525_p7 }
  0x41   : > { %p1528_p13 = pnand %p1527_p11, %p1521_p6 }
  0x43   : > { %1531 = shalt.err (!%p1528_p13)
}
  0x44   : > { %1352 = dma.hbm_to_vmem [thread:$0]  (!%p1678_p9), %s1724_s11, 16, %s212_s18, %s202_s30  }
  0x45   : > { %p1888_p8 = scmp.ne.s32.totalorder %s1887_s8, 0 }
  0x46   : > { %s1750_s4 = sand.u32 (!%p1888_p8), 1, %s1570_s13   ;;  %p1889_p7 = scmp.ne.s32.totalorder (!%p1888_p8), %s1884_s23, 0 }
  0x47   : > { %220 = sbr.rel (%p1888_p8) target bundleno = 381 (0x17d), region = 32  ;;  %s1185_s9 = sshll.u32 (!%p1888_p8), %s1750_s4, 9 }
  0x48   : > { %s223_s10 = scalar_lea.sflag (!%p1888_p8), [#allocation3], %s1750_s4  ;;  %s1754_s12 = scalar_lea.vmem (!%p1888_p8), [#allocation2], %s1185_s9 }
  0x4e   : > { %1557 = dma.done.wait (%p1889_p7), %s223_s10, 8192  }
  0x4f   : > { %1559 = vsyncadd (%p1889_p7), %s223_s10, 4294959104  ;;  %s232_s6 = scalar_lea.sflag [#allocation5], %s1750_s4  ;;  %s234_s8 = scalar_lea.vmem [#allocation4], %s1750_s4 }
  0x50   : > { %1561 = dma.done.wait (%p1889_p7), %s232_s6, 16  }
  0x51   : > { %1563 = vsyncadd (%p1889_p7), %s232_s6, 4294967280  ;;  %v1407_v0 = vld [vmem:[%s1754_s12 + $0x40] sm:$0xff]   ;;  %v1411_v4 = vld [vmem:[%s1754_s12 + $0x48] sm:$0xff]   ;;  %v1593_v22 = vmov 1966171168   ;;  %v431_v24 = vlaneseq  ;;  %p284_p9 = scmp.lt.s32.totalorder %s1578_s15, 2 }
  0x52   : > { %v1408_v1 = vld [vmem:[%s1754_s12 + $0xc0] sm:$0xff]   ;;  %1254 = vmatprep.subr.bf16.mxu0 %v1407_v0  ;;  %v1412_v5 = vld [vmem:[%s1754_s12 + $0xc8] sm:$0xff]   ;;  %v1415_v8 = vld [vmem:[%s1754_s12 + $0x50] sm:$0xff]   ;;  %v429_v23 = vunpack.c.l.s4 %v1593_v22 }
  0x53   : > { %v1409_v2 = vld [vmem:[%s1754_s12] sm:$0xff]   ;;  %1276 = vmatprep.subr.bf16.mxu1 %v1408_v1  ;;  %v1413_v6 = vld [vmem:[%s1754_s12 + $0x8] sm:$0xff]   ;;  %v1416_v9 = vld [vmem:[%s1754_s12 + $0xd0] sm:$0xff]   ;;  %v432_v30 = vshrl.u32 %v431_v24, 7  ;;  %s1898_s15 = smov (!%p284_p9, %s1578_s15), 2 }
  0x54   : > { %v1410_v3 = vld [vmem:[%s1754_s12 + $0x80] sm:$0xff]   ;;  %1255 = vmatpush3.bf16.msra.mxu0 %v1409_v2  ;;  %v1414_v7 = vld [vmem:[%s1754_s12 + $0x88] sm:$0xff]   ;;  %v1417_v10 = vld [vmem:[%s1754_s12 + $0x10] sm:$0xff]   ;;  %v430_v29 = vunpack.c.0.s8 %v429_v23  ;;  %s1186_s18 = sshll.u32 %s1898_s15, 1 }
  0x55   : > { %1277 = vmatpush3.bf16.msra.mxu1 %v1410_v3  ;;  %1256 = vmatprep.subr.bf16.mxu0 %v1411_v4  ;;  %v1418_v11 = vld [vmem:[%s1754_s12 + $0x90] sm:$0xff]   ;;  %v1419_v12 = vld [vmem:[%s1754_s12 + $0x58] sm:$0xff]   ;;  %v1423_v16 = vld [vmem:[%s1754_s12 + $0x60] sm:$0xff]   ;;  %s1851_s7 = scalar_lea.vmem %s1881_s3, %s1186_s18 }
  0x56   : > { %1278 = vmatprep.subr.bf16.mxu1 %v1412_v5  ;;  %v1420_v13 = vld [vmem:[%s1754_s12 + $0xd8] sm:$0xff]   ;;  %v1424_v17 = vld [vmem:[%s1754_s12 + $0xe0] sm:$0xff]   ;;  %v1427_v20 = vld [vmem:[%s1754_s12 + $0x68] sm:$0xff]   ;;  %v1796_v35 = vsub.s32 %v430_v29, %v432_v30 }
  0x57   : > { %v1421_v14 = vld [vmem:[%s1754_s12 + $0x18] sm:$0xff]   ;;  %v1425_v18 = vld [vmem:[%s1754_s12 + $0x20] sm:$0xff]   ;;  %v1428_v21 = vld [vmem:[%s1754_s12 + $0xe8] sm:$0xff]  }
  0x58   : > { %1257 = vmatpush3.bf16.msra.mxu0 %v1413_v6  ;;  %v1422_v15 = vld [vmem:[%s1754_s12 + $0x98] sm:$0xff]   ;;  %v1426_v19 = vld [vmem:[%s1754_s12 + $0xa0] sm:$0xff]   ;;  %v1429_v25 = vld [vmem:[%s1754_s12 + $0x28] sm:$0xff]  }
  0x59   : > { %1279 = vmatpush3.bf16.msra.mxu1 %v1414_v7  ;;  %1258 = vmatprep.subr.bf16.mxu0 %v1415_v8  ;;  %v1430_v26 = vld [vmem:[%s1754_s12 + $0xa8] sm:$0xff]   ;;  %v1431_v27 = vld [vmem:[%s1754_s12 + $0x70] sm:$0xff]   ;;  %v1435_v33 = vld [vmem:[%s1754_s12 + $0x78] sm:$0xff]  }
  0x5a   : > { %1280 = vmatprep.subr.bf16.mxu1 %v1416_v9  ;;  %v1432_v28 = vld [vmem:[%s1754_s12 + $0xf0] sm:$0xff]   ;;  %v1436_v34 = vld [vmem:[%s1754_s12 + $0xf8] sm:$0xff]   ;;  %v297_v38 = vld [vmem:[%s1878_s0] sm:$0xff] }
  0x5b   : > { %v1433_v31 = vld [vmem:[%s1754_s12 + $0x30] sm:$0xff]   ;;  %v1437_v36 = vld [vmem:[%s1754_s12 + $0x38] sm:$0xff]   ;;  %v427_v39 = vcombine.high %v297_v38, %v297_v38  ;;  %v434_v40 = vrot.slane %v297_v38, %v1796_v35  ;;  %v1440_v41 = vld [vmem:[%s1754_s12 + $0x140] sm:$0xff]  }
  0x5c   : > { %1259 = vmatpush3.bf16.msra.mxu0 %v1417_v10  ;;  %v1434_v32 = vld [vmem:[%s1754_s12 + $0xb0] sm:$0xff]   ;;  %v1438_v37 = vld [vmem:[%s1754_s12 + $0xb8] sm:$0xff]   ;;  %v1441_v42 = vld [vmem:[%s1754_s12 + $0x1c0] sm:$0xff]  }
  0x5d   : > { %1281 = vmatpush3.bf16.msra.mxu1 %v1418_v11  ;;  %1260 = vmatprep.subr.bf16.mxu0 %v1419_v12  ;;  %v442_v43 = vcombine.high %v434_v40, %v434_v40  ;;  %v450_v44 = vrot.slane %v434_v40, %v1796_v35  ;;  %v1808_v45 = vrot.slane %v427_v39, %v1796_v35  ;;  %v1442_v47 = vld [vmem:[%s1754_s12 + $0x100] sm:$0xff]   ;;  %v1444_v50 = vld [vmem:[%s1754_s12 + $0x148] sm:$0xff]   ;;  %v1448_v57 = vld [vmem:[%s1754_s12 + $0x150] sm:$0xff]  }
  0x5e   : > { %1282 = vmatprep.subr.bf16.mxu1 %v1420_v13  ;;  %v1443_v52 = vld [vmem:[%s1754_s12 + $0x180] sm:$0xff]   ;;  %v1445_v54 = vld [vmem:[%s1754_s12 + $0x1c8] sm:$0xff]   ;;  %v1449_v59 = vld [vmem:[%s1754_s12 + $0x1d0] sm:$0xff]  }
  0x5f   : > { %v464_v46 = vrot.slane %v442_v43, %v1796_v35  ;;  %v443_v48 = vcombine.high %v1808_v45, %v1808_v45  ;;  %v472_v49 = vcombine.high %v450_v44, %v450_v44  ;;  %v1446_v55 = vld [vmem:[%s1754_s12 + $0x108] sm:$0xff]   ;;  %v1450_v60 = vld [vmem:[%s1754_s12 + $0x110] sm:$0xff]   ;;  %v1452_v61 = vld [vmem:[%s1754_s12 + $0x158] sm:$0xff]  }
  0x60   : > { %1261 = vmatpush3.bf16.msra.mxu0 %v1421_v14  ;;  %v1447_v58 = vld [vmem:[%s1754_s12 + $0x188] sm:$0xff]   ;;  %v1451_v62 = vld [vmem:[%s1754_s12 + $0x190] sm:$0xff]   ;;  %v1453_v63 = vld [vmem:[%s1754_s12 + $0x1d8] sm:$0xff]  }
  0x61   : > { %1283 = vmatpush3.bf16.msra.mxu1 %v1422_v15  ;;  %1262 = vmatprep.subr.bf16.mxu0 %v1423_v16  ;;  %v474_v51 = vcombine.high %v464_v46, %v464_v46  ;;  %v471_v53 = vrot.slane %v443_v48, %v1796_v35  ;;  %v1454_v0 = vld [vmem:[%s1754_s12 + $0x118] sm:$0xff]   ;;  %v1456_v1 = vld [vmem:[%s1754_s12 + $0x160] sm:$0xff]   ;;  %v1460_v5 = vld [vmem:[%s1754_s12 + $0x168] sm:$0xff]  }
  0x62   : > { %1284 = vmatprep.subr.bf16.mxu1 %v1424_v17  ;;  %900 = vmatprep.mubr.bf16.mxu0 %v464_v46  ;;  %v1455_v2 = vld [vmem:[%s1754_s12 + $0x198] sm:$0xff]   ;;  %v1457_v3 = vld [vmem:[%s1754_s12 + $0x1e0] sm:$0xff]   ;;  %v1461_v7 = vld [vmem:[%s1754_s12 + $0x1e8] sm:$0xff]   ;;  %v457_v17 = vrot.slane %v1808_v45, %v1796_v35 }
  0x63   : > { %940 = vmatprep.mubr.bf16.mxu1 %v474_v51  ;;  %v475_v56 = vcombine.high %v471_v53, %v471_v53  ;;  %v1458_v4 = vld [vmem:[%s1754_s12 + $0x120] sm:$0xff]   ;;  %v1462_v8 = vld [vmem:[%s1754_s12 + $0x128] sm:$0xff]   ;;  %v1464_v9 = vld [vmem:[%s1754_s12 + $0x170] sm:$0xff]  }
  0x64   : > { %1263 = vmatpush3.bf16.msra.mxu0 %v1425_v18  ;;  %v1459_v6 = vld [vmem:[%s1754_s12 + $0x1a0] sm:$0xff]   ;;  %v1463_v10 = vld [vmem:[%s1754_s12 + $0x1a8] sm:$0xff]   ;;  %v1465_v11 = vld [vmem:[%s1754_s12 + $0x1f0] sm:$0xff]  }
  0x65   : > { %1285 = vmatpush3.bf16.msra.mxu1 %v1426_v19  ;;  %1264 = vmatprep.subr.bf16.mxu0 %v1427_v20  ;;  %v1466_v12 = vld [vmem:[%s1754_s12 + $0x130] sm:$0xff]   ;;  %v1468_v13 = vld [vmem:[%s1754_s12 + $0x178] sm:$0xff]   ;;  %v473_v19 = vcombine.high %v457_v17, %v457_v17  ;;  %v1594_v20 = vmov 0.0   ;;  %v1251_v46 = vld [vmem:[%s234_s8] ss:$0 sm:$0xff] }
  0x66   : > { %1286 = vmatprep.subr.bf16.mxu1 %v1428_v21  ;;  %v1467_v14 = vld [vmem:[%s1754_s12 + $0x1b0] sm:$0xff]   ;;  %v1469_v15 = vld [vmem:[%s1754_s12 + $0x1f8] sm:$0xff]   ;;  %295 = vst [vmem:[%s1851_s7] sm:$0x3] %v1594_v20 }
  0x67   : > { %v1470_v16 = vld [vmem:[%s1754_s12 + $0x138] sm:$0xff]  }
  0x68   : > { %1265 = vmatpush3.bf16.msra.mxu0 %v1429_v25  ;;  %v1471_v18 = vld [vmem:[%s1754_s12 + $0x1b8] sm:$0xff]  }
  0x69   : > { %1287 = vmatpush3.bf16.msra.mxu1 %v1430_v26  ;;  %1266 = vmatprep.subr.bf16.mxu0 %v1431_v27 }
  0x6a   : > { %1288 = vmatprep.subr.bf16.mxu1 %v1432_v28 }
  0x6c   : > { %1267 = vmatpush3.bf16.msra.mxu0 %v1433_v31 }
  0x6d   : > { %1289 = vmatpush3.bf16.msra.mxu1 %v1434_v32  ;;  %1268 = vmatprep.subr.bf16.mxu0 %v1435_v33 }
  0x6e   : > { %1290 = vmatprep.subr.bf16.mxu1 %v1436_v34 }
  0x70   : > { %1269 = vmatpush3.bf16.msra.mxu0 %v1437_v36 }
  0x71   : > { %1291 = vmatpush3.bf16.msra.mxu1 %v1438_v37  ;;  %1298 = vmatprep.subr.bf16.mxu0 %v1440_v41 }
  0x72   : > { %1320 = vmatprep.subr.bf16.mxu1 %v1441_v42  ;;  %v296_v42 = vld [vmem:[%s1851_s7] sm:$0x3] }
  0x73   : > { %901 = vmatmul.mubr.bf16.vlgmr.msra.gmra.mrb[0].mxu0 %v450_v44 }
  0x74   : > { %1299 = vmatpush3.bf16.msra.mxu0 %v1442_v47  ;;  %941 = vmatmul.mubr.bf16.vlgmr.msra.gmra.mrb[0].mxu1 %v472_v49 }
  0x75   : > { %1300 = vmatprep.subr.bf16.mxu0 %v1444_v50  ;;  %1321 = vmatpush3.bf16.msra.mxu1 %v1443_v52 }
  0x76   : > { %980 = vmatprep.mubr.bf16.mxu0 %v471_v53  ;;  %1322 = vmatprep.subr.bf16.mxu1 %v1445_v54 }
  0x77   : > { %1020 = vmatprep.mubr.bf16.mxu1 %v475_v56 }
  0x78   : > { %1301 = vmatpush3.bf16.msra.mxu0 %v1446_v55 }
  0x79   : > { %1302 = vmatprep.subr.bf16.mxu0 %v1448_v57  ;;  %1323 = vmatpush3.bf16.msra.mxu1 %v1447_v58 }
  0x7a   : > { %1324 = vmatprep.subr.bf16.mxu1 %v1449_v59 }
  0x7c   : > { %1303 = vmatpush3.bf16.msra.mxu0 %v1450_v60 }
  0x7d   : > { %1304 = vmatprep.subr.bf16.mxu0 %v1452_v61  ;;  %1325 = vmatpush3.bf16.msra.mxu1 %v1451_v62 }
  0x7e   : > { %1326 = vmatprep.subr.bf16.mxu1 %v1453_v63 }
  0x80   : > { %1305 = vmatpush3.bf16.msra.mxu0 %v1454_v0 }
  0x81   : > { %1306 = vmatprep.subr.bf16.mxu0 %v1456_v1  ;;  %1327 = vmatpush3.bf16.msra.mxu1 %v1455_v2 }
  0x82   : > { %1328 = vmatprep.subr.bf16.mxu1 %v1457_v3 }
  0x84   : > { %1307 = vmatpush3.bf16.msra.mxu0 %v1458_v4 }
  0x85   : > { %1308 = vmatprep.subr.bf16.mxu0 %v1460_v5  ;;  %1329 = vmatpush3.bf16.msra.mxu1 %v1459_v6 }
  0x86   : > { %1330 = vmatprep.subr.bf16.mxu1 %v1461_v7 }
  0x88   : > { %1309 = vmatpush3.bf16.msra.mxu0 %v1462_v8 }
  0x89   : > { %1310 = vmatprep.subr.bf16.mxu0 %v1464_v9  ;;  %1331 = vmatpush3.bf16.msra.mxu1 %v1463_v10 }
  0x8a   : > { %1332 = vmatprep.subr.bf16.mxu1 %v1465_v11 }
  0x8c   : > { %1311 = vmatpush3.bf16.msra.mxu0 %v1466_v12 }
  0x8d   : > { %1312 = vmatprep.subr.bf16.mxu0 %v1468_v13  ;;  %1333 = vmatpush3.bf16.msra.mxu1 %v1467_v14 }
  0x8e   : > { %1334 = vmatprep.subr.bf16.mxu1 %v1469_v15 }
  0x90   : > { %1313 = vmatpush3.bf16.msra.mxu0 %v1470_v16 }
  0x91   : > { %1335 = vmatpush3.bf16.msra.mxu1 %v1471_v18 }
  0x93   : > { %981 = vmatmul.mubr.bf16.vlgmr.msra.gmra.mrb[4].mxu0 %v457_v17 }
  0x94   : > { %1021 = vmatmul.mubr.bf16.vlgmr.msra.gmra.mrb[4].mxu1 %v473_v19 }
 0x146   : > { %v1270_v21 = vpop.f32.mrb[0].mxu0 }
 0x147   : > { %v1271_v22 = vpop.f32.mrb[1].mxu0  ;;  %v1292_v23 = vpop.f32.mrb[0].mxu1 }
 0x148   : > { %v1272_v24 = vadd.f32 %v1271_v22, %v1270_v21  ;;  %v1273_v25 = vpop.f32.mrb[2].mxu0  ;;  %v1293_v26 = vpop.f32.mrb[1].mxu1 }
 0x149   : > { %v1274_v27 = vpop.f32.mrb[3].mxu0  ;;  %v1294_v28 = vadd.f32 %v1293_v26, %v1292_v23  ;;  %v1295_v29 = vpop.f32.mrb[2].mxu1 }
 0x14a   : > { %v1296_v30 = vpop.f32.mrb[3].mxu1 }
 0x14b   : > { %v943_v31 = vadd.f32 %v1294_v28, %v1272_v24 }
 0x166   : > { %v1314_v32 = vpop.f32.mrb[4].mxu0 }
 0x167   : > { %v1315_v33 = vpop.f32.mrb[5].mxu0  ;;  %v1336_v34 = vpop.f32.mrb[4].mxu1 }
 0x168   : > { %v1316_v35 = vadd.f32 %v1315_v33, %v1314_v32  ;;  %v1317_v36 = vpop.f32.mrb[6].mxu0  ;;  %v1337_v37 = vpop.f32.mrb[5].mxu1 }
 0x169   : > { %v1318_v38 = vpop.f32.mrb[7].mxu0  ;;  %v1338_v40 = vadd.f32 %v1337_v37, %v1336_v34  ;;  %v1339_v41 = vpop.f32.mrb[6].mxu1 }
 0x16a   : > { %v983_v39 = vadd.f32 %v1316_v35, %v943_v31  ;;  %v1340_v43 = vpop.f32.mrb[7].mxu1 }
 0x16c   : > { %v1023_v44 = vadd.f32 %v1338_v40, %v983_v39 }
 0x16e   : > { %v1028_v45 = vadd.f32 %v1023_v44, %v296_v42 }
 0x170   : > { %1029 = vst [vmem:[%s1851_s7] sm:$0x3] %v1028_v45 }
 0x177   : > { %v1033_v47 = vld [vmem:[%s1851_s7] sm:$0x3] }
 0x178   : > { %v1041_v48 = vadd.f32 %v1251_v46, %v1033_v47 }
 0x17a   : > { %v1042_v49 = vmax.f32 %v1041_v48, 0.0 }
 0x17c   : > { %1043 = vst [vmem:[%s1851_s7] sm:$0x3] %v1042_v49 }
 0x17d PF: > { %s19_s17 = sadd.s32 1, %s1586_s17   ;;  %s1890_s12 = smov %s1570_s13 }
 0x17e   : > { %p16_p12 = scmp.ge.s32.totalorder %s19_s17, 5   ;;  %s1891_s13 = smov %s1574_s14 }
 0x17f   : > { %s1892_s14 = smov %s1664_s24  ;;  %s1893_s15 = smov %s1582_s16 }
 0x180   : > { %s1894_s16 = smov %s1896_s19  ;;  %18 = sbr.rel (!%p16_p12) target bundleno = 6 (0x6), region = 96 }
 0x187   :  { %1071 = vsyncpa [#allocation3], 1 }
 0x188   :  { %1073 = vsyncpa [#allocation3 + $0x1], 1 }
 0x189   :  { %1074 = vsyncpa [#allocation5], 1 }
 0x18a   :  { %1076 = vsyncpa [#allocation5 + $0x1], 1 }

</bundles_post_ra>
